<compile_context>
chip_gen: v5e
topology: v5e:2x2
jax: 0.10.0
libtpu: 0.0.40
codegen_flags: <defaults>
</compile_context>

<pallas_src>
import jax
import jax.numpy as jnp
from jax.experimental import pallas as pl
from jax.experimental.pallas import tpu as pltpu

# Layer sizes from the PyTorch module.
IN_DIM = 784          # 28 * 28
H1 = 512
H2 = 256
OUT_DIM = 10

OUT_PAD = 128         # lane-dense padded class dim
NEG_INF = -1e30       # bias for padded logit columns -> exp == 0 exactly
MAX_BM = 256          # batch tile (parallel axis -> megacore on v7x)


def discriminator_kernel(x_ref, w1_ref, b1_ref, w2_ref, b2_ref, w3_ref, b3_ref,
                         out_ref):
    """One batch tile: fc1+ReLU -> fc2+ReLU -> fc3 -> softmax, fully fused.
    Weights are bf16, activations are cast to bf16 right before each MXU dot,
    accumulation and bias/ReLU/softmax math are f32."""
    # ---- fc1 + ReLU ---------------------------------------------------------
    x = x_ref[...].astype(jnp.bfloat16)                       # (BM, 784)
    h1 = jnp.dot(x, w1_ref[...], preferred_element_type=jnp.float32)
    h1 = jnp.maximum(h1 + b1_ref[...], 0.0)                   # (BM, 512)

    # ---- fc2 + ReLU ---------------------------------------------------------
    h2 = jnp.dot(h1.astype(jnp.bfloat16), w2_ref[...],
                 preferred_element_type=jnp.float32)
    h2 = jnp.maximum(h2 + b2_ref[...], 0.0)                   # (BM, 256)

    # ---- fc3 (class dim padded 10 -> 128) -----------------------------------
    logits = jnp.dot(h2.astype(jnp.bfloat16), w3_ref[...],
                     preferred_element_type=jnp.float32)
    logits = logits + b3_ref[...]          # padded columns biased to -1e30

    # ---- numerically stable softmax over the padded class dim ---------------
    # Padded columns: exp(-1e30 - m) == 0 exactly, so rows sum over the 10
    # real classes only.  Exact division keeps row sums == 1 to f32 precision.
    m = jnp.max(logits, axis=-1, keepdims=True)
    e = jnp.exp(logits - m)
    out_ref[...] = e / jnp.sum(e, axis=-1, keepdims=True)     # (BM, 128)


def prepare_params(params):
    """One-time weight prep: bf16 cast + class-dim padding (hoisted out of the
    per-call forward path so the Pallas kernel is the only weight reader)."""
    w1, b1, w2, b2, w3, b3 = params
    w1c = w1.astype(jnp.bfloat16)                                   # (784, 512)
    w2c = w2.astype(jnp.bfloat16)                                   # (512, 256)
    w3p = (jnp.zeros((H2, OUT_PAD), jnp.float32)
           .at[:, :OUT_DIM].set(w3).astype(jnp.bfloat16))           # (256, 128)
    b1c = b1.reshape(1, H1).astype(jnp.float32)
    b2c = b2.reshape(1, H2).astype(jnp.float32)
    b3p = (jnp.full((1, OUT_PAD), NEG_INF, jnp.float32)
           .at[:, :OUT_DIM].set(b3.reshape(1, OUT_DIM)))
    return (w1c, b1c, w2c, b2c, w3p, b3p)


def discriminator_forward(x, prepared_params):
    """x: anything flattening to (-1, 784). Returns softmax probs (B, 10)."""
    w1c, b1c, w2c, b2c, w3p, b3p = prepared_params

    x2d = x.reshape(-1, IN_DIM).astype(jnp.float32)      # torch view(-1, 784)
    B = x2d.shape[0]

    # Batch tile: single tile for small B, MAX_BM tiles for large B.
    bm = MAX_BM if B > MAX_BM else max(8, ((B + 7) // 8) * 8)
    Bp = ((B + bm - 1) // bm) * bm
    xp = x2d if Bp == B else jnp.zeros((Bp, IN_DIM), jnp.float32).at[:B].set(x2d)

    grid = (Bp // bm,)

    flops = 2 * Bp * (IN_DIM * H1 + H1 * H2 + H2 * OUT_PAD)
    bytes_accessed = (xp.size * 4
                      + w1c.size * 2 + w2c.size * 2 + w3p.size * 2
                      + (H1 + H2 + OUT_PAD) * 4
                      + Bp * OUT_PAD * 4)

    out_padded = pl.pallas_call(
        discriminator_kernel,
        out_shape=jax.ShapeDtypeStruct((Bp, OUT_PAD), jnp.float32),
        grid_spec=pltpu.PrefetchScalarGridSpec(
            num_scalar_prefetch=0,
            grid=grid,
            in_specs=[
                pl.BlockSpec((bm, IN_DIM), lambda i: (i, 0)),    # x  (batch-tiled)
                pl.BlockSpec((IN_DIM, H1), lambda i: (0, 0)),    # w1 bf16 (full)
                pl.BlockSpec((1, H1), lambda i: (0, 0)),         # b1
                pl.BlockSpec((H1, H2), lambda i: (0, 0)),        # w2 bf16 (full)
                pl.BlockSpec((1, H2), lambda i: (0, 0)),         # b2
                pl.BlockSpec((H2, OUT_PAD), lambda i: (0, 0)),   # w3 bf16 (padded)
                pl.BlockSpec((1, OUT_PAD), lambda i: (0, 0)),    # b3 (padded, -1e30)
            ],
            out_specs=pl.BlockSpec((bm, OUT_PAD), lambda i: (i, 0)),
        ),
        compiler_params=pltpu.CompilerParams(
            dimension_semantics=("parallel",),   # batch tiles are independent
            vmem_limit_bytes=32 << 20,
        ),
        cost_estimate=pl.CostEstimate(
            flops=flops,
            transcendentals=Bp * OUT_PAD,
            bytes_accessed=bytes_accessed,
        ),
    )(xp, w1c, b1c, w2c, b2c, w3p, b3p)

    return out_padded[:B, :OUT_DIM]


def init_params(key, input_dim=IN_DIM, out_dim=OUT_DIM):
    """Deterministic synthetic init (uniform fan-in, like torch defaults)."""
    dims = [(input_dim, H1), (H1, H2), (H2, out_dim)]
    params = []
    for i, (fan_in, fan_out) in enumerate(dims):
        kw, kb = jax.random.split(jax.random.fold_in(key, i))
        bound = 1.0 / (fan_in ** 0.5)
        w = jax.random.uniform(kw, (fan_in, fan_out), jnp.float32, -bound, bound)
        b = jax.random.uniform(kb, (1, fan_out), jnp.float32, -bound, bound)
        params += [w, b]
    return tuple(params)


if __name__ == "__main__":
    key = jax.random.PRNGKey(0)
    k_x, k_p = jax.random.split(key)

    B = 8
    x = jax.random.normal(k_x, (B, 1, 28, 28), dtype=jnp.float32)  # MNIST-like
    params = init_params(k_p)
    prepared = prepare_params(params)                 # one-time weight prep

    out = discriminator_forward(x, prepared)
    out = jax.block_until_ready(out)

    assert out.shape == (B, OUT_DIM)

    # sanity: softmax rows sum to 1 (exact division -> tight tolerance)
    row_sums = jnp.sum(out, axis=-1)
    assert bool(jnp.allclose(row_sums, 1.0, atol=1e-4)), row_sums

    # cross-check against a plain-JAX reference using the same bf16 math
    w1c, b1c, w2c, b2c, w3p, b3p = prepared
    xr = x.reshape(-1, IN_DIM).astype(jnp.bfloat16)
    h1 = jnp.maximum(jnp.dot(xr, w1c, preferred_element_type=jnp.float32) + b1c, 0.0)
    h2 = jnp.maximum(jnp.dot(h1.astype(jnp.bfloat16), w2c,
                             preferred_element_type=jnp.float32) + b2c, 0.0)
    logits = jnp.dot(h2.astype(jnp.bfloat16), w3p[:, :OUT_DIM],
                     preferred_element_type=jnp.float32) + b3p[:, :OUT_DIM]
    ref = jax.nn.softmax(logits, axis=-1)
    assert bool(jnp.allclose(out, ref, atol=2e-3)), jnp.max(jnp.abs(out - ref))

    print("KERNEL_OK")
</pallas_src>

<mosaic_0001>
module attributes {stable_mosaic.version = 11 : i64} {
  func.func @discriminator_kernel(%arg0: i32, %arg1: memref<8x784xf32, #tpu.memory_space<vmem>>, %arg2: memref<784x512xbf16, #tpu.memory_space<vmem>>, %arg3: memref<1x512xf32, #tpu.memory_space<vmem>>, %arg4: memref<512x256xbf16, #tpu.memory_space<vmem>>, %arg5: memref<1x256xf32, #tpu.memory_space<vmem>>, %arg6: memref<256x128xbf16, #tpu.memory_space<vmem>>, %arg7: memref<1x128xf32, #tpu.memory_space<vmem>>, %arg8: memref<8x128xf32, #tpu.memory_space<vmem>>) attributes {dimension_semantics = [#tpu.dimension_semantics<parallel>], iteration_bounds = array<i64: 1>, scalar_prefetch = 0 : i64, scratch_operands = 0 : i64, tpu.core_type = #tpu.core_type<tc>, window_params = [{transform_indices = @transform_0, window_bounds = array<i64: 8, 784>}, {pipeline_mode = #tpu.pipeline_mode<synchronous>, transform_indices = @transform_1, window_bounds = array<i64: 784, 512>}, {pipeline_mode = #tpu.pipeline_mode<synchronous>, transform_indices = @transform_2, window_bounds = array<i64: 1, 512>}, {pipeline_mode = #tpu.pipeline_mode<synchronous>, transform_indices = @transform_3, window_bounds = array<i64: 512, 256>}, {pipeline_mode = #tpu.pipeline_mode<synchronous>, transform_indices = @transform_4, window_bounds = array<i64: 1, 256>}, {pipeline_mode = #tpu.pipeline_mode<synchronous>, transform_indices = @transform_5, window_bounds = array<i64: 256, 128>}, {pipeline_mode = #tpu.pipeline_mode<synchronous>, transform_indices = @transform_6, window_bounds = array<i64: 1, 128>}, {transform_indices = @transform_7, window_bounds = array<i64: 8, 128>}]} {
    %c0 = arith.constant 0 : index
    %c0_0 = arith.constant 0 : index
    %0 = vector.load %arg1[%c0, %c0_0] : memref<8x784xf32, #tpu.memory_space<vmem>>, vector<8x784xf32>
    %1 = arith.truncf %0 : vector<8x784xf32> to vector<8x784xbf16>
    %c0_1 = arith.constant 0 : index
    %c0_2 = arith.constant 0 : index
    %2 = vector.load %arg2[%c0_1, %c0_2] : memref<784x512xbf16, #tpu.memory_space<vmem>>, vector<784x512xbf16>
    %cst = arith.constant dense<0.000000e+00> : vector<8x512xf32>
    %3 = tpu.matmul %1, %2, %cst {dimension_numbers = #tpu.dot_dimension_numbers<[1], [0], [0], [1], [0, 0, 1, 1], [], []>} : vector<8x784xbf16>, vector<784x512xbf16>, vector<8x512xf32> -> vector<8x512xf32>
    %c0_3 = arith.constant 0 : index
    %c0_4 = arith.constant 0 : index
    %4 = vector.load %arg3[%c0_3, %c0_4] : memref<1x512xf32, #tpu.memory_space<vmem>>, vector<1x512xf32>
    %5 = vector.broadcast %4 : vector<1x512xf32> to vector<8x512xf32>
    %6 = arith.addf %3, %5 : vector<8x512xf32>
    %cst_5 = arith.constant 0.000000e+00 : f32
    %7 = vector.broadcast %cst_5 : f32 to vector<8x512xf32>
    %8 = arith.maximumf %6, %7 : vector<8x512xf32>
    %9 = arith.truncf %8 : vector<8x512xf32> to vector<8x512xbf16>
    %c0_6 = arith.constant 0 : index
    %c0_7 = arith.constant 0 : index
    %10 = vector.load %arg4[%c0_6, %c0_7] : memref<512x256xbf16, #tpu.memory_space<vmem>>, vector<512x256xbf16>
    %cst_8 = arith.constant dense<0.000000e+00> : vector<8x256xf32>
    %11 = tpu.matmul %9, %10, %cst_8 {dimension_numbers = #tpu.dot_dimension_numbers<[1], [0], [0], [1], [0, 0, 1, 1], [], []>} : vector<8x512xbf16>, vector<512x256xbf16>, vector<8x256xf32> -> vector<8x256xf32>
    %c0_9 = arith.constant 0 : index
    %c0_10 = arith.constant 0 : index
    %12 = vector.load %arg5[%c0_9, %c0_10] : memref<1x256xf32, #tpu.memory_space<vmem>>, vector<1x256xf32>
    %13 = vector.broadcast %12 : vector<1x256xf32> to vector<8x256xf32>
    %14 = arith.addf %11, %13 : vector<8x256xf32>
    %cst_11 = arith.constant 0.000000e+00 : f32
    %15 = vector.broadcast %cst_11 : f32 to vector<8x256xf32>
    %16 = arith.maximumf %14, %15 : vector<8x256xf32>
    %17 = arith.truncf %16 : vector<8x256xf32> to vector<8x256xbf16>
    %c0_12 = arith.constant 0 : index
    %c0_13 = arith.constant 0 : index
    %18 = vector.load %arg6[%c0_12, %c0_13] : memref<256x128xbf16, #tpu.memory_space<vmem>>, vector<256x128xbf16>
    %cst_14 = arith.constant dense<0.000000e+00> : vector<8x128xf32>
    %19 = tpu.matmul %17, %18, %cst_14 {dimension_numbers = #tpu.dot_dimension_numbers<[1], [0], [0], [1], [0, 0, 1, 1], [], []>} : vector<8x256xbf16>, vector<256x128xbf16>, vector<8x128xf32> -> vector<8x128xf32>
    %c0_15 = arith.constant 0 : index
    %c0_16 = arith.constant 0 : index
    %20 = vector.load %arg7[%c0_15, %c0_16] : memref<1x128xf32, #tpu.memory_space<vmem>>, vector<1x128xf32>
    %21 = vector.broadcast %20 : vector<1x128xf32> to vector<8x128xf32>
    %22 = arith.addf %19, %21 : vector<8x128xf32>
    %cst_17 = arith.constant dense<0xFF800000> : vector<8xf32>
    %23 = vector.multi_reduction <maximumf>, %22, %cst_17 [1] : vector<8x128xf32> to vector<8xf32>
    %24 = vector.shape_cast %23 : vector<8xf32> to vector<8x1xf32>
    %25 = vector.broadcast %24 : vector<8x1xf32> to vector<8x128xf32>
    %26 = arith.subf %22, %25 : vector<8x128xf32>
    %27 = math.exp %26 : vector<8x128xf32>
    %cst_18 = arith.constant dense<0.000000e+00> : vector<8xf32>
    %28 = vector.multi_reduction <add>, %27, %cst_18 [1] : vector<8x128xf32> to vector<8xf32>
    %29 = vector.shape_cast %28 : vector<8xf32> to vector<8x1xf32>
    %30 = vector.broadcast %29 : vector<8x1xf32> to vector<8x128xf32>
    %31 = arith.divf %27, %30 : vector<8x128xf32>
    %c0_19 = arith.constant 0 : index
    %c0_20 = arith.constant 0 : index
    %32 = vector.load %arg8[%c0_19, %c0_20] : memref<8x128xf32, #tpu.memory_space<vmem>>, vector<8x128xf32>
    tpu.vector_store %arg8[%c0_19, %c0_20], %31 {strides = array<i32>} : memref<8x128xf32, #tpu.memory_space<vmem>>, vector<8x128xf32>,
    return
  }
  func.func @transform_0(%arg0: i32) -> (i32, i32) {
    %c0_i32 = arith.constant 0 : i32
    %c0_i32_0 = arith.constant 0 : i32
    return %arg0, %c0_i32 : i32, i32
  }
  func.func @transform_1(%arg0: i32) -> (i32, i32) {
    %c0_i32 = arith.constant 0 : i32
    %c0_i32_0 = arith.constant 0 : i32
    %c0_i32_1 = arith.constant 0 : i32
    return %c0_i32, %c0_i32_0 : i32, i32
  }
  func.func @transform_2(%arg0: i32) -> (i32, i32) {
    %c0_i32 = arith.constant 0 : i32
    %c0_i32_0 = arith.constant 0 : i32
    %c0_i32_1 = arith.constant 0 : i32
    return %c0_i32, %c0_i32_0 : i32, i32
  }
  func.func @transform_3(%arg0: i32) -> (i32, i32) {
    %c0_i32 = arith.constant 0 : i32
    %c0_i32_0 = arith.constant 0 : i32
    %c0_i32_1 = arith.constant 0 : i32
    return %c0_i32, %c0_i32_0 : i32, i32
  }
  func.func @transform_4(%arg0: i32) -> (i32, i32) {
    %c0_i32 = arith.constant 0 : i32
    %c0_i32_0 = arith.constant 0 : i32
    %c0_i32_1 = arith.constant 0 : i32
    return %c0_i32, %c0_i32_0 : i32, i32
  }
  func.func @transform_5(%arg0: i32) -> (i32, i32) {
    %c0_i32 = arith.constant 0 : i32
    %c0_i32_0 = arith.constant 0 : i32
    %c0_i32_1 = arith.constant 0 : i32
    return %c0_i32, %c0_i32_0 : i32, i32
  }
  func.func @transform_6(%arg0: i32) -> (i32, i32) {
    %c0_i32 = arith.constant 0 : i32
    %c0_i32_0 = arith.constant 0 : i32
    %c0_i32_1 = arith.constant 0 : i32
    return %c0_i32, %c0_i32_0 : i32, i32
  }
  func.func @transform_7(%arg0: i32) -> (i32, i32) {
    %c0_i32 = arith.constant 0 : i32
    %c0_i32_0 = arith.constant 0 : i32
    return %arg0, %c0_i32 : i32, i32
  }
}

</mosaic_0001>

<bundles_post_ra>
// kernel: tpu_custom_call.1
= control target key start
LH: loop header
LB: loop body
LE: loop exit
PB: predicated region body
PF: predicated region fallthrough
CT: control target
= control target key end

     0   :  { %12 = vsyncpa [#allocation3], 0  ;;  %s4073_s0 = inlined_call_operand.hbm [shape: f32[8,784], index: 0, kind: input, shape index: {}]   ;;  %s4074_s1 = inlined_call_operand.hbm [shape: bf16[784,512], index: 1, kind: input, shape index: {}]   ;;  %s4075_s2 = inlined_call_operand.hbm [shape: f32[1,512], index: 2, kind: input, shape index: {}]   ;;  %s4076_s3 = inlined_call_operand.hbm [shape: bf16[512,256], index: 3, kind: input, shape index: {}]   ;;  %s4077_s4 = inlined_call_operand.vmem [shape: f32[1,256], index: 4, kind: input, shape index: {}]   ;;  %s4078_s5 = inlined_call_operand.hbm [shape: bf16[256,128], index: 5, kind: input, shape index: {}]   ;;  %s4079_s6 = inlined_call_operand.vmem [shape: f32[1,128], index: 6, kind: input, shape index: {}]   ;;  %s4080_s7 = inlined_call_operand.hbm [shape: f32[8,128], index: 7, kind: output, shape index: {}]  }
   0x1   :  { %13 = vsyncpa [#allocation6], 0 }
   0x2   :  { %14 = vsyncpa [#allocation9], 0  ;;  %s31_s26 = sshll.u32 %s4074_s1, 4  ;;  %s32_s26 = int_to_ptr.hbm [resolvable:$true] %s31_s26 }
   0x3   :  { %15 = vsyncpa [#allocation4], 0  ;;  %s3929_s27 = smov [#allocation5]   ;;  %s55_s8 = sshll.u32 %s4076_s3, 4  ;;  %s56_s8 = int_to_ptr.hbm [resolvable:$true] %s55_s8 }
   0x4   :  { %s33_s28 = sshll.u32 %s3929_s27, 4  ;;  %s3930_s9 = smov 256   ;;  %s34_s28 = int_to_ptr.vmem [resolvable:$true] %s33_s28 }
   0x5   :  { %s3931_s10 = smov 16   ;;  %s3932_s11 = smov [#allocation8]  }
   0x6   :  { %39 = dma.hbm_to_vmem [thread:$0]  %s32_s26, 25088, %s34_s28, [#allocation6], %s3930_s9, %s3930_s9, %s3931_s10  }
   0x7   :  { %s57_s12 = sshll.u32 %s3932_s11, 4  ;;  %s3933_s13 = smov 128   ;;  %s58_s12 = int_to_ptr.vmem [resolvable:$true] %s57_s12 }
   0x8   :  { %s3934_s14 = smov 8   ;;  %s21_s16 = sshll.u32 %s4073_s0, 4  ;;  %s22_s16 = int_to_ptr.hbm [resolvable:$true] %s21_s16 }
   0x9   :  { %63 = dma.hbm_to_vmem [thread:$0]  %s56_s8, 8192, %s58_s12, [#allocation9], %s3933_s13, %s3933_s13, %s3934_s14  }
   0xa   :  { %s3935_s17 = smov [#allocation2]   ;;  %s45_s20 = sshll.u32 %s4075_s2, 4  ;;  %s46_s20 = int_to_ptr.hbm [resolvable:$true] %s45_s20 }
   0xb   :  { %s23_s18 = sshll.u32 %s3935_s17, 4  ;;  %s3936_s21 = smov [#allocation7]   ;;  %s24_s18 = int_to_ptr.vmem [resolvable:$true] %s23_s18 }
   0xc   :  { %26 = dma.hbm_to_vmem [thread:$0]  %s22_s16, 896, %s24_s18, [#allocation3]  }
   0xd   :  { %s47_s22 = sshll.u32 %s3936_s21, 4  ;;  %s70_s25 = sshll.u32 %s4078_s5, 4  ;;  %s48_s22 = int_to_ptr.vmem [resolvable:$true] %s47_s22  ;;  %s71_s25 = int_to_ptr.hbm [resolvable:$true] %s70_s25 }
   0xe   :  { %50 = dma.hbm_to_vmem [thread:$0]  %s46_s20, 64, %s48_s22, [#allocation6]  }
   0xf   :  { %s3937_s0 = smov [#allocation10]   ;;  %s3938_s27 = smov 64  }
  0x10   :  { %s72_s26 = sshll.u32 %s3937_s0, 4  ;;  %s3939_s28 = smov 4   ;;  %s73_s26 = int_to_ptr.vmem [resolvable:$true] %s72_s26 }
  0x11   :  { %78 = dma.hbm_to_vmem [thread:$0]  %s71_s25, 2048, %s73_s26, [#allocation9], %s3938_s27, %s3938_s27, %s3939_s28  }
  0x12   :  { %3921 = dma.done.wait [#allocation3], 896  }
  0x13   :  { %3922 = vsyncadd [#allocation3], 4294966400 }
  0x14   :  { %3923 = dma.done.wait [#allocation6], 25152  }
  0x15   :  { %3924 = vsyncadd [#allocation6], 4294942144 }
  0x16   :  { %3925 = dma.done.wait [#allocation9], 10240  }
  0x17   :  { %3926 = vsyncadd [#allocation9], 4294957056  ;;  %v2490_v0 = vld [vmem:[#allocation5 + $0xe0] sm:$0xf]  ;;  %v3514_v1 = vld [vmem:[#allocation5 + $0xec] sm:$0xf0] }
  0x18   :  { %v2618_v2 = vld [vmem:[#allocation5 + $0x1e0] sm:$0xf]  ;;  %v2491_v3 = vor.u32 %v3514_v1, %v2490_v0  ;;  %v3546_v4 = vld [vmem:[#allocation5 + $0x1ec] sm:$0xf0]  ;;  %vm1302_vm0 = vcmask 130048   ;;  %s2364_s10 = sshll.u32 %s4080_s7, 4  ;;  %s2365_s10 = int_to_ptr.hbm [resolvable:$true] %s2364_s10 }
  0x19   :  { %v2746_v5 = vld [vmem:[#allocation5 + $0x2e0] sm:$0xf]  ;;  %v3578_v6 = vld [vmem:[#allocation5 + $0x2ec] sm:$0xf0]  ;;  %v2619_v7 = vor.u32 %v3546_v4, %v2618_v2 }
  0x1a   :  { %v2747_v8 = vor.u32 %v3578_v6, %v2746_v5  ;;  %v2874_v9 = vld [vmem:[#allocation5 + $0x3e0] sm:$0xf]  ;;  %v3610_v10 = vld [vmem:[#allocation5 + $0x3ec] sm:$0xf0]  ;;  %1306 = vmatpush.bf16.msra.mxu0 %v2491_v3 }
  0x1b   :  { %v2474_v11 = vld [vmem:[#allocation5 + $0xc0] sm:$0xf]  ;;  %v2875_v12 = vor.u32 %v3610_v10, %v2874_v9  ;;  %v3510_v13 = vld [vmem:[#allocation5 + $0xcc] sm:$0xf0]  ;;  %1319 = vmatpush.bf16.msra.mxu1 %v2619_v7 }
  0x1c   :  { %v2602_v14 = vld [vmem:[#allocation5 + $0x1c0] sm:$0xf]  ;;  %v3542_v15 = vld [vmem:[#allocation5 + $0x1cc] sm:$0xf0]  ;;  %1332 = vmatpush.bf16.msra.mxu2 %v2747_v8  ;;  %v2475_v16 = vor.u32 %v3510_v13, %v2474_v11 }
  0x1d   :  { %v2603_v17 = vor.u32 %v3542_v15, %v2602_v14  ;;  %v2730_v18 = vld [vmem:[#allocation5 + $0x2c0] sm:$0xf]  ;;  %v3574_v19 = vld [vmem:[#allocation5 + $0x2cc] sm:$0xf0]  ;;  %1345 = vmatpush.bf16.msra.mxu3 %v2875_v12 }
  0x1e   :  { %v2858_v20 = vld [vmem:[#allocation5 + $0x3c0] sm:$0xf]  ;;  %v2731_v21 = vor.u32 %v3574_v19, %v2730_v18  ;;  %v3606_v22 = vld [vmem:[#allocation5 + $0x3cc] sm:$0xf0]  ;;  %1307 = vmatpush.bf16.msra.mxu0 %v2475_v16 }
  0x1f   :  { %v2458_v23 = vld [vmem:[#allocation5 + $0xa0] sm:$0xf]  ;;  %v3506_v24 = vld [vmem:[#allocation5 + $0xac] sm:$0xf0]  ;;  %v2859_v25 = vor.u32 %v3606_v22, %v2858_v20  ;;  %1320 = vmatpush.bf16.msra.mxu1 %v2603_v17 }
  0x20   :  { %v2586_v26 = vld [vmem:[#allocation5 + $0x1a0] sm:$0xf]  ;;  %v3538_v27 = vld [vmem:[#allocation5 + $0x1ac] sm:$0xf0]  ;;  %v2459_v29 = vor.u32 %v3506_v24, %v2458_v23  ;;  %1333 = vmatpush.bf16.msra.mxu2 %v2731_v21 }
  0x21   :  { %v2714_v28 = vld [vmem:[#allocation5 + $0x2a0] sm:$0xf]  ;;  %v3570_v30 = vld [vmem:[#allocation5 + $0x2ac] sm:$0xf0]  ;;  %v2587_v33 = vor.u32 %v3538_v27, %v2586_v26  ;;  %1346 = vmatpush.bf16.msra.mxu3 %v2859_v25 }
  0x22   :  { %v2842_v31 = vld [vmem:[#allocation5 + $0x3a0] sm:$0xf]  ;;  %v3602_v32 = vld [vmem:[#allocation5 + $0x3ac] sm:$0xf0]  ;;  %v2715_v34 = vor.u32 %v3570_v30, %v2714_v28  ;;  %1308 = vmatpush.bf16.msra.mxu0 %v2459_v29 }
  0x23   :  { %v2442_v35 = vld [vmem:[#allocation5 + $0x80] sm:$0xf]  ;;  %v3502_v36 = vld [vmem:[#allocation5 + $0x8c] sm:$0xf0]  ;;  %v2843_v38 = vor.u32 %v3602_v32, %v2842_v31  ;;  %1321 = vmatpush.bf16.msra.mxu1 %v2587_v33  ;;  %v3512_v33 = vld [vmem:[#allocation5 + $0xe4] sm:$0xf] }
  0x24   :  { %v2570_v37 = vld [vmem:[#allocation5 + $0x180] sm:$0xf]  ;;  %v3534_v39 = vld [vmem:[#allocation5 + $0x18c] sm:$0xf0]  ;;  %v2443_v44 = vor.u32 %v3502_v36, %v2442_v35  ;;  %1334 = vmatpush.bf16.msra.mxu2 %v2715_v34  ;;  %v2492_v34 = vld [vmem:[#allocation5 + $0xf0] sm:$0xf0] }
  0x25   :  { %v2698_v40 = vld [vmem:[#allocation5 + $0x280] sm:$0xf]  ;;  %v3566_v41 = vld [vmem:[#allocation5 + $0x28c] sm:$0xf0]  ;;  %v2571_v45 = vor.u32 %v3534_v39, %v2570_v37  ;;  %1347 = vmatpush.bf16.msra.mxu3 %v2843_v38  ;;  %v104_v35 = vld [vmem:[#allocation2 + $0x10] sm:$0xff] }
  0x26   :  { %v2826_v42 = vld [vmem:[#allocation5 + $0x380] sm:$0xf]  ;;  %v3598_v43 = vld [vmem:[#allocation5 + $0x38c] sm:$0xf0]  ;;  %v2699_v46 = vor.u32 %v3566_v41, %v2698_v40  ;;  %1309 = vmatpush.bf16.msra.mxu0 %v2443_v44  ;;  %v102_v40 = vld [vmem:[#allocation2] sm:$0xff] }
  0x27   :  { %v2426_v47 = vld [vmem:[#allocation5 + $0x60] sm:$0xf]  ;;  %v3498_v48 = vld [vmem:[#allocation5 + $0x6c] sm:$0xf0]  ;;  %v2827_v50 = vor.u32 %v3598_v43, %v2826_v42  ;;  %1322 = vmatpush.bf16.msra.mxu1 %v2571_v45  ;;  %v3544_v43 = vld [vmem:[#allocation5 + $0x1e4] sm:$0xf] }
  0x28   :  { %v2554_v49 = vld [vmem:[#allocation5 + $0x160] sm:$0xf]  ;;  %v3530_v51 = vld [vmem:[#allocation5 + $0x16c] sm:$0xf0]  ;;  %v2427_v56 = vor.u32 %v3498_v48, %v2426_v47  ;;  %1335 = vmatpush.bf16.msra.mxu2 %v2699_v46  ;;  %v2620_v44 = vld [vmem:[#allocation5 + $0x1f0] sm:$0xf0]  ;;  %v2495_v47 = vor.u32 %v3512_v33, %v2492_v34 }
  0x29   :  { %v2682_v52 = vld [vmem:[#allocation5 + $0x260] sm:$0xf]  ;;  %v3562_v53 = vld [vmem:[#allocation5 + $0x26c] sm:$0xf0]  ;;  %v2555_v57 = vor.u32 %v3530_v51, %v2554_v49  ;;  %1348 = vmatpush.bf16.msra.mxu3 %v2827_v50  ;;  %v3996_v51 = vpack.c.bf16 %v104_v35, %v104_v35  ;;  %v3528_v35 = vld [vmem:[#allocation5 + $0x164] sm:$0xf] }
  0x2a   :  { %v2810_v54 = vld [vmem:[#allocation5 + $0x360] sm:$0xf]  ;;  %v3594_v55 = vld [vmem:[#allocation5 + $0x36c] sm:$0xf0]  ;;  %v2683_v58 = vor.u32 %v3562_v53, %v2682_v52  ;;  %1310 = vmatpush.bf16.msra.mxu0 %v2427_v56  ;;  %v3508_v53 = vld [vmem:[#allocation5 + $0xc4] sm:$0xf] }
  0x2b   :  { %v2410_v59 = vld [vmem:[#allocation5 + $0x40] sm:$0xf]  ;;  %v3494_v60 = vld [vmem:[#allocation5 + $0x4c] sm:$0xf0]  ;;  %v2811_v62 = vor.u32 %v3594_v55, %v2810_v54  ;;  %1323 = vmatpush.bf16.msra.mxu1 %v2555_v57  ;;  %v2476_v54 = vld [vmem:[#allocation5 + $0xd0] sm:$0xf0]  ;;  %v3998_v55 = vpack.c.bf16 %v102_v40, %v102_v40 }
  0x2c   :  { %v2538_v61 = vld [vmem:[#allocation5 + $0x140] sm:$0xf]  ;;  %v3526_v63 = vld [vmem:[#allocation5 + $0x14c] sm:$0xf0]  ;;  %v2411_v4 = vor.u32 %v3494_v60, %v2410_v59  ;;  %1336 = vmatpush.bf16.msra.mxu2 %v2683_v58  ;;  %v2623_v59 = vor.u32 %v3544_v43, %v2620_v44  ;;  %v3492_v43 = vld [vmem:[#allocation5 + $0x44] sm:$0xf] }
  0x2d   :  { %v2666_v0 = vld [vmem:[#allocation5 + $0x240] sm:$0xf]  ;;  %v3558_v1 = vld [vmem:[#allocation5 + $0x24c] sm:$0xf0]  ;;  %v2539_v5 = vor.u32 %v3526_v63, %v2538_v61  ;;  %1349 = vmatpush.bf16.msra.mxu3 %v2811_v62  ;;  %v3540_v61 = vld [vmem:[#allocation5 + $0x1c4] sm:$0xf] }
  0x2e   :  { %v2794_v2 = vld [vmem:[#allocation5 + $0x340] sm:$0xf]  ;;  %v3590_v3 = vld [vmem:[#allocation5 + $0x34c] sm:$0xf0]  ;;  %v2667_v6 = vor.u32 %v3558_v1, %v2666_v0  ;;  %1311 = vmatpush.bf16.msra.mxu0 %v2411_v4  ;;  %v2604_v62 = vld [vmem:[#allocation5 + $0x1d0] sm:$0xf0]  ;;  %v2479_v0 = vor.u32 %v3508_v53, %v2476_v54 }
  0x2f   :  { %v2394_v7 = vld [vmem:[#allocation5 + $0x20] sm:$0xf]  ;;  %v3490_v8 = vld [vmem:[#allocation5 + $0x2c] sm:$0xf0]  ;;  %v2795_v10 = vor.u32 %v3590_v3, %v2794_v2  ;;  %1324 = vmatpush.bf16.msra.mxu1 %v2539_v5  ;;  %v2412_v44 = vld [vmem:[#allocation5 + $0x50] sm:$0xf0] }
  0x30   :  { %v2522_v9 = vld [vmem:[#allocation5 + $0x120] sm:$0xf]  ;;  %v3522_v11 = vld [vmem:[#allocation5 + $0x12c] sm:$0xf0]  ;;  %v2395_v16 = vor.u32 %v3490_v8, %v2394_v7  ;;  %1337 = vmatpush.bf16.msra.mxu2 %v2667_v6  ;;  %v3504_v6 = vld [vmem:[#allocation5 + $0xa4] sm:$0xf]  ;;  %v2607_v8 = vor.u32 %v3540_v61, %v2604_v62 }
  0x31   :  { %v2650_v12 = vld [vmem:[#allocation5 + $0x220] sm:$0xf]  ;;  %v3554_v13 = vld [vmem:[#allocation5 + $0x22c] sm:$0xf0]  ;;  %v2523_v20 = vor.u32 %v3522_v11, %v2522_v9  ;;  %1350 = vmatpush.bf16.msra.mxu3 %v2795_v10  ;;  %v2460_v7 = vld [vmem:[#allocation5 + $0xb0] sm:$0xf0] }
  0x32   :  { %v2778_v14 = vld [vmem:[#allocation5 + $0x320] sm:$0xf]  ;;  %v3586_v15 = vld [vmem:[#allocation5 + $0x32c] sm:$0xf0]  ;;  %v2651_v21 = vor.u32 %v3554_v13, %v2650_v12  ;;  %1312 = vmatpush.bf16.msra.mxu0 %v2395_v16  ;;  %v3536_v10 = vld [vmem:[#allocation5 + $0x1a4] sm:$0xf]  ;;  %v2463_v13 = vor.u32 %v3504_v6, %v2460_v7 }
  0x33   :  { %v2378_v17 = vld [vmem:[#allocation5] sm:$0xf]  ;;  %v3486_v18 = vld [vmem:[#allocation5 + $0xc] sm:$0xf0]  ;;  %v2779_v25 = vor.u32 %v3586_v15, %v2778_v14  ;;  %1325 = vmatpush.bf16.msra.mxu1 %v2523_v20  ;;  %v2588_v11 = vld [vmem:[#allocation5 + $0x1b0] sm:$0xf0] }
  0x34   :  { %v2506_v19 = vld [vmem:[#allocation5 + $0x100] sm:$0xf]  ;;  %v3518_v22 = vld [vmem:[#allocation5 + $0x10c] sm:$0xf0]  ;;  %v2379_v32 = vor.u32 %v3486_v18, %v2378_v17  ;;  %1338 = vmatpush.bf16.msra.mxu2 %v2651_v21  ;;  %v3500_v18 = vld [vmem:[#allocation5 + $0x84] sm:$0xf]  ;;  %v2591_v20 = vor.u32 %v3536_v10, %v2588_v11 }
  0x35   :  { %v2634_v23 = vld [vmem:[#allocation5 + $0x200] sm:$0xf]  ;;  %v3550_v24 = vld [vmem:[#allocation5 + $0x20c] sm:$0xf0]  ;;  %v2507_v36 = vor.u32 %v3518_v22, %v2506_v19  ;;  %1351 = vmatpush.bf16.msra.mxu3 %v2779_v25  ;;  %v2444_v19 = vld [vmem:[#allocation5 + $0x90] sm:$0xf0] }
  0x36   :  { %v2762_v26 = vld [vmem:[#allocation5 + $0x300] sm:$0xf]  ;;  %v3582_v27 = vld [vmem:[#allocation5 + $0x30c] sm:$0xf0]  ;;  %v2635_v37 = vor.u32 %v3550_v24, %v2634_v23  ;;  %1313 = vmatpush.bf16.msra.mxu0 %v2379_v32  ;;  %v3532_v22 = vld [vmem:[#allocation5 + $0x184] sm:$0xf]  ;;  %v2447_v25 = vor.u32 %v3500_v18, %v2444_v19 }
  0x37   :  { %v3002_v28 = vld [vmem:[#allocation5 + $0x4e0] sm:$0xf]  ;;  %v3642_v29 = vld [vmem:[#allocation5 + $0x4ec] sm:$0xf0]  ;;  %v2763_v41 = vor.u32 %v3582_v27, %v2762_v26  ;;  %1326 = vmatpush.bf16.msra.mxu1 %v2507_v36  ;;  %v2572_v23 = vld [vmem:[#allocation5 + $0x190] sm:$0xf0] }
  0x38   :  { %v3130_v30 = vld [vmem:[#allocation5 + $0x5e0] sm:$0xf]  ;;  %v3674_v31 = vld [vmem:[#allocation5 + $0x5ec] sm:$0xf0]  ;;  %v3003_v42 = vor.u32 %v3642_v29, %v3002_v28  ;;  %1339 = vmatpush.bf16.msra.mxu2 %v2635_v37  ;;  %v108_v32 = vld [vmem:[#allocation2 + $0x30] sm:$0xff]  ;;  %v2575_v33 = vor.u32 %v3532_v22, %v2572_v23 }
  0x39   :  { %v3146_v38 = vld [vmem:[#allocation5 + $0x600] sm:$0xf]  ;;  %v3678_v39 = vld [vmem:[#allocation5 + $0x60c] sm:$0xf0]  ;;  %v3131_v46 = vor.u32 %v3674_v31, %v3130_v30  ;;  %1352 = vmatpush.bf16.msra.mxu3 %v2763_v41  ;;  %1314 = vmatmul.bf16.vlgmr.msra.gmra.mxu0 %v3998_v55  ;;  %v3496_v30 = vld [vmem:[#allocation5 + $0x64] sm:$0xf] }
  0x3a   :  { %v105_v45 = vld [vmem:[#allocation2 + $0x18] sm:$0xff]  ;;  %v3638_v49 = vld [vmem:[#allocation5 + $0x4cc] sm:$0xf0]  ;;  %v3147_v56 = vor.u32 %v3678_v39, %v3146_v38  ;;  %1358 = vmatpush.bf16.msrb.mxu0 %v3003_v42  ;;  %v2428_v31 = vld [vmem:[#allocation5 + $0x70] sm:$0xf0] }
  0x3b   :  { %v2986_v48 = vld [vmem:[#allocation5 + $0x4c0] sm:$0xf]  ;;  %v3670_v52 = vld [vmem:[#allocation5 + $0x5cc] sm:$0xf0]  ;;  %v4000_v57 = vpack.c.bf16 %v105_v45, %v105_v45  ;;  %1371 = vmatpush.bf16.msrb.mxu1 %v3131_v46  ;;  %1340 = vmatmul.bf16.vlgmr.msra.gmra.mxu2 %v3996_v51  ;;  %v2556_v36 = vld [vmem:[#allocation5 + $0x170] sm:$0xf0]  ;;  %v2431_v38 = vor.u32 %v3496_v30, %v2428_v31  ;;  %v4008_v45 = vpack.c.bf16 %v108_v32, %v108_v32 }
  0x3c   :  { %v3114_v50 = vld [vmem:[#allocation5 + $0x5c0] sm:$0xf]  ;;  %v103_v58 = vld [vmem:[#allocation2 + $0x8] sm:$0xff]  ;;  %v2987_v60 = vor.u32 %v3638_v49, %v2986_v48  ;;  %1391 = vmatpush.bf16.msrb.mxu2 %v3147_v56  ;;  %v2559_v46 = vor.u32 %v3528_v35, %v2556_v36  ;;  %v3524_v48 = vld [vmem:[#allocation5 + $0x144] sm:$0xf] }
  0x3d   :  { %1397 = vmatpush.bf16.msrb.mxu3 %v2495_v47  ;;  %v3115_v63 = vor.u32 %v3670_v52, %v3114_v50  ;;  %v2970_v1 = vld [vmem:[#allocation5 + $0x4a0] sm:$0xf]  ;;  %v3634_v2 = vld [vmem:[#allocation5 + $0x4ac] sm:$0xf0]  ;;  %v4004_v4 = vpack.c.bf16 %v103_v58, %v103_v58  ;;  %v2540_v49 = vld [vmem:[#allocation5 + $0x150] sm:$0xf0]  ;;  %v2415_v52 = vor.u32 %v3492_v43, %v2412_v44 }
  0x3e   :  { %v3098_v3 = vld [vmem:[#allocation5 + $0x5a0] sm:$0xf]  ;;  %v3666_v5 = vld [vmem:[#allocation5 + $0x5ac] sm:$0xf0]  ;;  %1353 = vmatmul.bf16.vlgmr.msra.gmra.mxu3 %v4000_v57  ;;  %1359 = vmatpush.bf16.msrb.mxu0 %v2987_v60  ;;  %v2971_v9 = vor.u32 %v3634_v2, %v2970_v1  ;;  %v2396_v60 = vld [vmem:[#allocation5 + $0x30] sm:$0xf0]  ;;  %v2543_v61 = vor.u32 %v3524_v48, %v2540_v49 }
  0x3f   :  { %1372 = vmatpush.bf16.msrb.mxu1 %v3115_v63  ;;  %v3099_v12 = vor.u32 %v3666_v5, %v3098_v3  ;;  %v2954_v14 = vld [vmem:[#allocation5 + $0x480] sm:$0xf]  ;;  %v3630_v15 = vld [vmem:[#allocation5 + $0x48c] sm:$0xf0]  ;;  %v3520_v63 = vld [vmem:[#allocation5 + $0x124] sm:$0xf] }
  0x40   :  { %1410 = vmatpush.bf16.msra.mxu2 %v2623_v59  ;;  %v3082_v16 = vld [vmem:[#allocation5 + $0x580] sm:$0xf]  ;;  %1327 = vmatmul.bf16.vlgmr.msra.gmra.mxu1 %v4004_v4  ;;  %v3662_v17 = vld [vmem:[#allocation5 + $0x58c] sm:$0xf0]  ;;  %v2955_v21 = vor.u32 %v3630_v15, %v2954_v14  ;;  %v3488_v59 = vld [vmem:[#allocation5 + $0x24] sm:$0xf] }
  0x41   :  { %1398 = vmatpush.bf16.msrb.mxu3 %v2479_v0  ;;  %v3083_v24 = vor.u32 %v3662_v17, %v3082_v16  ;;  %v2938_v26 = vld [vmem:[#allocation5 + $0x460] sm:$0xf]  ;;  %v3626_v27 = vld [vmem:[#allocation5 + $0x46c] sm:$0xf0]  ;;  %v2524_v0 = vld [vmem:[#allocation5 + $0x130] sm:$0xf0]  ;;  %v2399_v3 = vor.u32 %v3488_v59, %v2396_v60 }
  0x42   :  { %1360 = vmatpush.bf16.msrb.mxu0 %v2971_v9  ;;  %v3066_v28 = vld [vmem:[#allocation5 + $0x560] sm:$0xf]  ;;  %v3658_v29 = vld [vmem:[#allocation5 + $0x56c] sm:$0xf0]  ;;  %v2939_v34 = vor.u32 %v3626_v27, %v2938_v26  ;;  %v2380_v9 = vld [vmem:[#allocation5 + $0x10] sm:$0xf0]  ;;  %v2527_v14 = vor.u32 %v3520_v63, %v2524_v0 }
  0x43   :  { %1373 = vmatpush.bf16.msrb.mxu1 %v3099_v12  ;;  %v3067_v37 = vor.u32 %v3658_v29, %v3066_v28  ;;  %v2922_v39 = vld [vmem:[#allocation5 + $0x440] sm:$0xf]  ;;  %v3622_v40 = vld [vmem:[#allocation5 + $0x44c] sm:$0xf0]  ;;  %v3576_v10 = vld [vmem:[#allocation5 + $0x2e4] sm:$0xf] }
  0x44   :  { %1411 = vmatpush.bf16.msra.mxu2 %v2607_v8  ;;  %v3050_v41 = vld [vmem:[#allocation5 + $0x540] sm:$0xf]  ;;  %v3654_v42 = vld [vmem:[#allocation5 + $0x54c] sm:$0xf0]  ;;  %v2923_v47 = vor.u32 %v3622_v40, %v2922_v39  ;;  %v3484_v8 = vld [vmem:[#allocation5 + $0x4] sm:$0xf] }
  0x45   :  { %1399 = vmatpush.bf16.msrb.mxu3 %v2463_v13  ;;  %v3051_v50 = vor.u32 %v3654_v42, %v3050_v41  ;;  %v2906_v53 = vld [vmem:[#allocation5 + $0x420] sm:$0xf]  ;;  %v3618_v54 = vld [vmem:[#allocation5 + $0x42c] sm:$0xf0]  ;;  %v2748_v11 = vld [vmem:[#allocation5 + $0x2f0] sm:$0xf0] }
  0x46   :  { %1361 = vmatpush.bf16.msrb.mxu0 %v2955_v21  ;;  %v3034_v56 = vld [vmem:[#allocation5 + $0x520] sm:$0xf]  ;;  %v3650_v58 = vld [vmem:[#allocation5 + $0x52c] sm:$0xf0]  ;;  %v2907_v62 = vor.u32 %v3618_v54, %v2906_v53  ;;  %v3608_v12 = vld [vmem:[#allocation5 + $0x3e4] sm:$0xf] }
  0x47   :  { %1374 = vmatpush.bf16.msrb.mxu1 %v3083_v24  ;;  %v2890_v1 = vld [vmem:[#allocation5 + $0x400] sm:$0xf]  ;;  %v3035_v2 = vor.u32 %v3650_v58, %v3034_v56  ;;  %v3614_v5 = vld [vmem:[#allocation5 + $0x40c] sm:$0xf0]  ;;  %v2876_v13 = vld [vmem:[#allocation5 + $0x3f0] sm:$0xf0]  ;;  %v2751_v24 = vor.u32 %v3576_v10, %v2748_v11 }
  0x48   :  { %1412 = vmatpush.bf16.msra.mxu2 %v2591_v20  ;;  %v3018_v6 = vld [vmem:[#allocation5 + $0x500] sm:$0xf]  ;;  %v3646_v7 = vld [vmem:[#allocation5 + $0x50c] sm:$0xf0]  ;;  %v2891_v15 = vor.u32 %v3614_v5, %v2890_v1  ;;  %v3640_v16 = vld [vmem:[#allocation5 + $0x4e4] sm:$0xf]  ;;  %v2383_v20 = vor.u32 %v3484_v8, %v2380_v9 }
  0x49   :  { %1400 = vmatpush.bf16.msrb.mxu3 %v2447_v25  ;;  %v3004_v17 = vld [vmem:[#allocation5 + $0x4f0] sm:$0xf0]  ;;  %v106_v18 = vld [vmem:[#allocation2 + $0x20] sm:$0xff]  ;;  %v3019_v19 = vor.u32 %v3646_v7, %v3018_v6  ;;  %v3516_v21 = vld [vmem:[#allocation5 + $0x104] sm:$0xf]  ;;  %v2879_v25 = vor.u32 %v3608_v12, %v2876_v13 }
  0x4a   :  { %1362 = vmatpush.bf16.msrb.mxu0 %v2939_v34  ;;  %v2508_v22 = vld [vmem:[#allocation5 + $0x110] sm:$0xf0]  ;;  %v3672_v26 = vld [vmem:[#allocation5 + $0x5e4] sm:$0xf]  ;;  %v3007_v29 = vor.u32 %v3640_v16, %v3004_v17  ;;  %v4012_v30 = vpack.c.bf16 %v106_v18, %v106_v18 }
  0x4b   :  { %1375 = vmatpush.bf16.msrb.mxu1 %v3067_v37  ;;  %3160 = vmatmul.msk.bf16.vlgmr.msrb.gmra.mxu2 %vm1302_vm0, %v4008_v45  ;;  %v107_v23 = vld [vmem:[#allocation2 + $0x28] sm:$0xff]  ;;  %v3572_v28 = vld [vmem:[#allocation5 + $0x2c4] sm:$0xf]  ;;  %v2511_v34 = vor.u32 %v3516_v21, %v2508_v22 }
  0x4c   :  { %1413 = vmatpush.bf16.msra.mxu2 %v2575_v33  ;;  %v3132_v27 = vld [vmem:[#allocation5 + $0x5f0] sm:$0xf0]  ;;  %v3604_v32 = vld [vmem:[#allocation5 + $0x3c4] sm:$0xf]  ;;  %v4014_v35 = vpack.c.bf16 %v107_v23, %v107_v23 }
  0x4d   :  { %1401 = vmatpush.bf16.msrb.mxu3 %v2431_v38  ;;  %v2732_v31 = vld [vmem:[#allocation5 + $0x2d0] sm:$0xf0]  ;;  %v3636_v36 = vld [vmem:[#allocation5 + $0x4c4] sm:$0xf]  ;;  %v3135_v38 = vor.u32 %v3672_v26, %v3132_v27 }
  0x4e   :  { %1363 = vmatpush.bf16.msrb.mxu0 %v2923_v47  ;;  %v2860_v33 = vld [vmem:[#allocation5 + $0x3d0] sm:$0xf0]  ;;  %v2735_v39 = vor.u32 %v3572_v28, %v2732_v31  ;;  %v3668_v41 = vld [vmem:[#allocation5 + $0x5c4] sm:$0xf] }
  0x4f   :  { %1376 = vmatpush.bf16.msrb.mxu1 %v3051_v50  ;;  %v2988_v37 = vld [vmem:[#allocation5 + $0x4d0] sm:$0xf0]  ;;  %v2863_v40 = vor.u32 %v3604_v32, %v2860_v33  ;;  %v3568_v43 = vld [vmem:[#allocation5 + $0x2a4] sm:$0xf] }
  0x50   :  { %1414 = vmatpush.bf16.msra.mxu2 %v2559_v46  ;;  %v3116_v42 = vld [vmem:[#allocation5 + $0x5d0] sm:$0xf0]  ;;  %v2991_v44 = vor.u32 %v3636_v36, %v2988_v37  ;;  %v3600_v47 = vld [vmem:[#allocation5 + $0x3a4] sm:$0xf] }
  0x51   :  { %1402 = vmatpush.bf16.msrb.mxu3 %v2415_v52  ;;  %v2716_v46 = vld [vmem:[#allocation5 + $0x2b0] sm:$0xf0]  ;;  %v3632_v49 = vld [vmem:[#allocation5 + $0x4a4] sm:$0xf]  ;;  %v3119_v52 = vor.u32 %v3668_v41, %v3116_v42 }
  0x52   :  { %1364 = vmatpush.bf16.msrb.mxu0 %v2907_v62  ;;  %v2844_v48 = vld [vmem:[#allocation5 + $0x3b0] sm:$0xf0]  ;;  %v2719_v53 = vor.u32 %v3568_v43, %v2716_v46  ;;  %v3664_v56 = vld [vmem:[#allocation5 + $0x5a4] sm:$0xf] }
  0x53   :  { %1377 = vmatpush.bf16.msrb.mxu1 %v3035_v2  ;;  %v2972_v50 = vld [vmem:[#allocation5 + $0x4b0] sm:$0xf0]  ;;  %v2847_v54 = vor.u32 %v3600_v47, %v2844_v48  ;;  %v3564_v59 = vld [vmem:[#allocation5 + $0x284] sm:$0xf] }
  0x54   :  { %1415 = vmatpush.bf16.msra.mxu2 %v2543_v61  ;;  %v3100_v58 = vld [vmem:[#allocation5 + $0x5b0] sm:$0xf0]  ;;  %v2975_v60 = vor.u32 %v3632_v49, %v2972_v50  ;;  %v3596_v62 = vld [vmem:[#allocation5 + $0x384] sm:$0xf] }
  0x55   :  { %1403 = vmatpush.bf16.msrb.mxu3 %v2399_v3  ;;  %v2700_v61 = vld [vmem:[#allocation5 + $0x290] sm:$0xf0]  ;;  %v3628_v0 = vld [vmem:[#allocation5 + $0x484] sm:$0xf]  ;;  %v3103_v2 = vor.u32 %v3664_v56, %v3100_v58  ;;  %v2498_v56 = vld [vmem:[#allocation5 + $0xe8] sm:$0xf] }
  0x56   :  { %1365 = vmatpush.bf16.msrb.mxu0 %v2891_v15  ;;  %v2828_v63 = vld [vmem:[#allocation5 + $0x390] sm:$0xf0]  ;;  %v2703_v3 = vor.u32 %v3564_v59, %v2700_v61  ;;  %v3660_v6 = vld [vmem:[#allocation5 + $0x584] sm:$0xf]  ;;  %v3515_v58 = vld [vmem:[#allocation5 + $0xf4] sm:$0xf0] }
  0x57   :  { %1378 = vmatpush.bf16.msrb.mxu1 %v3019_v19  ;;  %v2956_v1 = vld [vmem:[#allocation5 + $0x490] sm:$0xf0]  ;;  %v2831_v5 = vor.u32 %v3596_v62, %v2828_v63  ;;  %v3560_v8 = vld [vmem:[#allocation5 + $0x264] sm:$0xf]  ;;  %v2626_v59 = vld [vmem:[#allocation5 + $0x1e8] sm:$0xf] }
  0x58   :  { %1416 = vmatpush.bf16.msra.mxu2 %v2527_v14  ;;  %v3084_v7 = vld [vmem:[#allocation5 + $0x590] sm:$0xf0]  ;;  %v2959_v9 = vor.u32 %v3628_v0, %v2956_v1  ;;  %v3592_v11 = vld [vmem:[#allocation5 + $0x364] sm:$0xf]  ;;  %v3547_v61 = vld [vmem:[#allocation5 + $0x1f4] sm:$0xf0] }
  0x59   :  { %1404 = vmatpush.bf16.msrb.mxu3 %v2383_v20  ;;  %1366 = vmatmul.bf16.vlgmr.msrb.gmra.mxu0 %v4012_v30  ;;  %v2684_v10 = vld [vmem:[#allocation5 + $0x270] sm:$0xf0]  ;;  %v3624_v13 = vld [vmem:[#allocation5 + $0x464] sm:$0xf]  ;;  %v3087_v15 = vor.u32 %v3660_v6, %v3084_v7  ;;  %v2499_v6 = vor.u32 %v3515_v58, %v2498_v56  ;;  %v2882_v7 = vld [vmem:[#allocation5 + $0x3e8] sm:$0xf] }
  0x5a   :  { %1423 = vmatpush.bf16.msra.mxu0 %v2751_v24  ;;  %1379 = vmatmul.bf16.vlgmr.msrb.gmra.mxu1 %v4014_v35  ;;  %v2812_v12 = vld [vmem:[#allocation5 + $0x370] sm:$0xf0]  ;;  %v2687_v16 = vor.u32 %v3560_v8, %v2684_v10  ;;  %v3656_v18 = vld [vmem:[#allocation5 + $0x564] sm:$0xf]  ;;  %v3611_v8 = vld [vmem:[#allocation5 + $0x3f4] sm:$0xf0]  ;;  %v2627_v10 = vor.u32 %v3547_v61, %v2626_v59 }
  0x5b   :  { %1436 = vmatpush.bf16.msra.mxu1 %v2879_v25  ;;  %v2940_v14 = vld [vmem:[#allocation5 + $0x470] sm:$0xf0]  ;;  %v2815_v17 = vor.u32 %v3592_v11, %v2812_v12  ;;  %v3556_v20 = vld [vmem:[#allocation5 + $0x244] sm:$0xf]  ;;  %v3511_v11 = vld [vmem:[#allocation5 + $0xd4] sm:$0xf0] }
  0x5c   :  { %1417 = vmatpush.bf16.msra.mxu2 %v2511_v34  ;;  %1405 = vmatmul.bf16.vlgmr.msrb.gmra.mxu3 %v3998_v55  ;;  %v3068_v19 = vld [vmem:[#allocation5 + $0x570] sm:$0xf0]  ;;  %v2943_v21 = vor.u32 %v3624_v13, %v2940_v14  ;;  %v3588_v23 = vld [vmem:[#allocation5 + $0x344] sm:$0xf]  ;;  %v2754_v13 = vld [vmem:[#allocation5 + $0x2e8] sm:$0xf] }
  0x5d   :  { %1449 = vmatpush.bf16.msra.mxu3 %v3007_v29  ;;  %v2668_v22 = vld [vmem:[#allocation5 + $0x250] sm:$0xf0]  ;;  %v3620_v25 = vld [vmem:[#allocation5 + $0x444] sm:$0xf]  ;;  %v3071_v27 = vor.u32 %v3656_v18, %v3068_v19  ;;  %v3579_v14 = vld [vmem:[#allocation5 + $0x2f4] sm:$0xf0]  ;;  %v2883_v18 = vor.u32 %v3611_v8, %v2882_v7 }
  0x5e   :  { %1424 = vmatpush.bf16.msra.mxu0 %v2735_v39  ;;  %v2796_v24 = vld [vmem:[#allocation5 + $0x350] sm:$0xf0]  ;;  %v2671_v28 = vor.u32 %v3556_v20, %v2668_v22  ;;  %v3652_v31 = vld [vmem:[#allocation5 + $0x544] sm:$0xf]  ;;  %v2866_v20 = vld [vmem:[#allocation5 + $0x3c8] sm:$0xf] }
  0x5f   :  { %1437 = vmatpush.bf16.msra.mxu1 %v2863_v40  ;;  %1418 = vmatmul.bf16.vlgmr.msra.gmra.mxu2 %v4004_v4  ;;  %v2924_v26 = vld [vmem:[#allocation5 + $0x450] sm:$0xf0]  ;;  %v2799_v29 = vor.u32 %v3588_v23, %v2796_v24  ;;  %v3552_v33 = vld [vmem:[#allocation5 + $0x224] sm:$0xf]  ;;  %v2466_v22 = vld [vmem:[#allocation5 + $0xa8] sm:$0xf]  ;;  %v2755_v23 = vor.u32 %v3579_v14, %v2754_v13 }
  0x60   :  { %1462 = vmatpush.bf16.msrb.mxu2 %v3135_v38  ;;  %v3052_v32 = vld [vmem:[#allocation5 + $0x550] sm:$0xf0]  ;;  %v2927_v34 = vor.u32 %v3620_v25, %v2924_v26  ;;  %v3584_v37 = vld [vmem:[#allocation5 + $0x324] sm:$0xf]  ;;  %v3507_v25 = vld [vmem:[#allocation5 + $0xb4] sm:$0xf0] }
  0x61   :  { %1450 = vmatpush.bf16.msra.mxu3 %v2991_v44  ;;  %v2652_v36 = vld [vmem:[#allocation5 + $0x230] sm:$0xf0]  ;;  %v3616_v39 = vld [vmem:[#allocation5 + $0x424] sm:$0xf]  ;;  %v3055_v41 = vor.u32 %v3652_v31, %v3052_v32  ;;  %v2738_v26 = vld [vmem:[#allocation5 + $0x2c8] sm:$0xf]  ;;  %v2467_v32 = vor.u32 %v3507_v25, %v2466_v22 }
  0x62   :  { %1425 = vmatpush.bf16.msra.mxu0 %v2719_v53  ;;  %v2780_v38 = vld [vmem:[#allocation5 + $0x330] sm:$0xf0]  ;;  %v3648_v42 = vld [vmem:[#allocation5 + $0x524] sm:$0xf]  ;;  %v2655_v46 = vor.u32 %v3552_v33, %v2652_v36  ;;  %v2850_v33 = vld [vmem:[#allocation5 + $0x3a8] sm:$0xf] }
  0x63   :  { %1438 = vmatpush.bf16.msra.mxu1 %v2847_v54  ;;  %v2908_v40 = vld [vmem:[#allocation5 + $0x430] sm:$0xf0]  ;;  %v3548_v44 = vld [vmem:[#allocation5 + $0x204] sm:$0xf]  ;;  %v2783_v47 = vor.u32 %v3584_v37, %v2780_v38  ;;  %v2450_v36 = vld [vmem:[#allocation5 + $0x88] sm:$0xf] }
  0x64   :  { %1463 = vmatpush.bf16.msrb.mxu2 %v3119_v52  ;;  %v3036_v43 = vld [vmem:[#allocation5 + $0x530] sm:$0xf0]  ;;  %v3580_v49 = vld [vmem:[#allocation5 + $0x304] sm:$0xf]  ;;  %v2911_v52 = vor.u32 %v3616_v39, %v2908_v40  ;;  %v3503_v39 = vld [vmem:[#allocation5 + $0x94] sm:$0xf0] }
  0x65   :  { %1451 = vmatpush.bf16.msra.mxu3 %v2975_v60  ;;  %v2636_v48 = vld [vmem:[#allocation5 + $0x210] sm:$0xf0]  ;;  %v3612_v53 = vld [vmem:[#allocation5 + $0x404] sm:$0xf]  ;;  %v3039_v60 = vor.u32 %v3648_v42, %v3036_v43  ;;  %v2722_v40 = vld [vmem:[#allocation5 + $0x2a8] sm:$0xf] }
  0x66   :  { %1426 = vmatpush.bf16.msra.mxu0 %v2703_v3  ;;  %v2764_v50 = vld [vmem:[#allocation5 + $0x310] sm:$0xf0]  ;;  %v3676_v62 = vld [vmem:[#allocation5 + $0x604] sm:$0xf]  ;;  %v2639_v0 = vor.u32 %v3548_v44, %v2636_v48  ;;  %v2578_v42 = vld [vmem:[#allocation5 + $0x188] sm:$0xf] }
  0x67   :  { %1439 = vmatpush.bf16.msra.mxu1 %v2831_v5  ;;  %v2892_v54 = vld [vmem:[#allocation5 + $0x410] sm:$0xf0]  ;;  %v2767_v1 = vor.u32 %v3580_v49, %v2764_v50  ;;  %v3535_v43 = vld [vmem:[#allocation5 + $0x194] sm:$0xf0]  ;;  %v2434_v49 = vld [vmem:[#allocation5 + $0x68] sm:$0xf] }
  0x68   :  { %1464 = vmatpush.bf16.msrb.mxu2 %v3103_v2  ;;  %v3148_v63 = vld [vmem:[#allocation5 + $0x610] sm:$0xf0]  ;;  %v3644_v2 = vld [vmem:[#allocation5 + $0x504] sm:$0xf]  ;;  %v2895_v5 = vor.u32 %v3612_v53, %v2892_v54  ;;  %v3599_v48 = vld [vmem:[#allocation5 + $0x394] sm:$0xf0] }
  0x69   :  { %1452 = vmatpush.bf16.msra.mxu3 %v2959_v9  ;;  %v3020_v3 = vld [vmem:[#allocation5 + $0x510] sm:$0xf0]  ;;  %v2482_v9 = vld [vmem:[#allocation5 + $0xc8] sm:$0xf]  ;;  %v3151_v12 = vor.u32 %v3676_v62, %v3148_v63  ;;  %v3499_v53 = vld [vmem:[#allocation5 + $0x74] sm:$0xf0] }
  0x6a   :  { %1427 = vmatpush.bf16.msra.mxu0 %v2687_v16  ;;  %v2610_v16 = vld [vmem:[#allocation5 + $0x1c8] sm:$0xf]  ;;  %v2483_v19 = vor.u32 %v3511_v11, %v2482_v9  ;;  %v3567_v56 = vld [vmem:[#allocation5 + $0x294] sm:$0xf0]  ;;  %v2435_v61 = vor.u32 %v3499_v53, %v2434_v49 }
  0x6b   :  { %1440 = vmatpush.bf16.msra.mxu1 %v2815_v17  ;;  %v3543_v17 = vld [vmem:[#allocation5 + $0x1d4] sm:$0xf0]  ;;  %v2706_v54 = vld [vmem:[#allocation5 + $0x288] sm:$0xf] }
  0x6c   :  { %1465 = vmatpush.bf16.msrb.mxu2 %v3087_v15  ;;  %v3023_v15 = vor.u32 %v3644_v2, %v3020_v3  ;;  %v2611_v24 = vor.u32 %v3543_v17, %v2610_v16  ;;  %v2562_v58 = vld [vmem:[#allocation5 + $0x168] sm:$0xf]  ;;  %v3531_v59 = vld [vmem:[#allocation5 + $0x174] sm:$0xf0] }
  0x6d   :  { %1453 = vmatpush.bf16.msra.mxu3 %v2943_v21  ;;  %v3607_v21 = vld [vmem:[#allocation5 + $0x3d4] sm:$0xf0]  ;;  %v2818_v62 = vld [vmem:[#allocation5 + $0x368] sm:$0xf]  ;;  %v2563_v2 = vor.u32 %v3531_v59, %v2562_v58 }
  0x6e   :  { %1428 = vmatpush.bf16.msra.mxu0 %v2671_v28  ;;  %v2594_v28 = vld [vmem:[#allocation5 + $0x1a8] sm:$0xf]  ;;  %v2867_v31 = vor.u32 %v3607_v21, %v2866_v20  ;;  %v3595_v63 = vld [vmem:[#allocation5 + $0x374] sm:$0xf0] }
  0x6f   :  { %1441 = vmatpush.bf16.msra.mxu1 %v2799_v29  ;;  %v3539_v29 = vld [vmem:[#allocation5 + $0x1b4] sm:$0xf0]  ;;  %v2546_v7 = vld [vmem:[#allocation5 + $0x148] sm:$0xf]  ;;  %v2819_v9 = vor.u32 %v3595_v63, %v2818_v62 }
  0x70   :  { %1466 = vmatpush.bf16.msrb.mxu2 %v3071_v27  ;;  %v3575_v27 = vld [vmem:[#allocation5 + $0x2d4] sm:$0xf0]  ;;  %v2595_v38 = vor.u32 %v3539_v29, %v2594_v28  ;;  %v2802_v11 = vld [vmem:[#allocation5 + $0x348] sm:$0xf] }
  0x71   :  { %1454 = vmatpush.bf16.msra.mxu3 %v2927_v34  ;;  %v3603_v34 = vld [vmem:[#allocation5 + $0x3b4] sm:$0xf0]  ;;  %v2739_v37 = vor.u32 %v3575_v27, %v2738_v26  ;;  %v2402_v13 = vld [vmem:[#allocation5 + $0x28] sm:$0xf] }
  0x72   :  { %1429 = vmatpush.bf16.msra.mxu0 %v2655_v46  ;;  %v2851_v44 = vor.u32 %v3603_v34, %v2850_v33  ;;  %v2451_v46 = vor.u32 %v3503_v39, %v2450_v36  ;;  %v3495_v3 = vld [vmem:[#allocation5 + $0x54] sm:$0xf0]  ;;  %v2674_v17 = vld [vmem:[#allocation5 + $0x248] sm:$0xf] }
  0x73   :  { %1442 = vmatpush.bf16.msra.mxu1 %v2783_v47  ;;  %v2834_v47 = vld [vmem:[#allocation5 + $0x388] sm:$0xf]  ;;  %v3527_v8 = vld [vmem:[#allocation5 + $0x154] sm:$0xf0] }
  0x74   :  { %1467 = vmatpush.bf16.msrb.mxu2 %v3055_v41  ;;  %v3571_v41 = vld [vmem:[#allocation5 + $0x2b4] sm:$0xf0]  ;;  %v2786_v22 = vld [vmem:[#allocation5 + $0x328] sm:$0xf] }
  0x75   :  { %1455 = vmatpush.bf16.msra.mxu3 %v2911_v52  ;;  %v2723_v50 = vor.u32 %v3571_v41, %v2722_v40  ;;  %v2579_v52 = vor.u32 %v3535_v43, %v2578_v42  ;;  %v3491_v16 = vld [vmem:[#allocation5 + $0x34] sm:$0xf0]  ;;  %v2386_v25 = vld [vmem:[#allocation5 + $0x8] sm:$0xf] }
  0x76   :  { %1430 = vmatpush.bf16.msra.mxu0 %v2639_v0  ;;  %v2418_v0 = vld [vmem:[#allocation5 + $0x48] sm:$0xf]  ;;  %v3523_v20 = vld [vmem:[#allocation5 + $0x134] sm:$0xf0] }
  0x77   :  { %1443 = vmatpush.bf16.msra.mxu1 %v2767_v1  ;;  %v2707_v1 = vor.u32 %v3567_v56, %v2706_v54  ;;  %v3487_v26 = vld [vmem:[#allocation5 + $0x14] sm:$0xf0]  ;;  %v2514_v29 = vld [vmem:[#allocation5 + $0x108] sm:$0xf] }
  0x78   :  { %1468 = vmatpush.bf16.msrb.mxu2 %v3039_v60  ;;  %v2835_v60 = vor.u32 %v3599_v48, %v2834_v47  ;;  %v3519_v33 = vld [vmem:[#allocation5 + $0x114] sm:$0xf0]  ;;  %v3010_v34 = vld [vmem:[#allocation5 + $0x4e8] sm:$0xf]  ;;  %v2387_v41 = vor.u32 %v3487_v26, %v2386_v25  ;;  %v3501_v25 = vld [vmem:[#allocation5 + $0x8c] sm:$0xf] }
  0x79   :  { %1456 = vmatpush.bf16.msra.mxu3 %v2895_v5  ;;  %1431 = vmatmul.bf16.vlgmr.msra.gmra.mxu0 %v3996_v51  ;;  %v2690_v5 = vld [vmem:[#allocation5 + $0x268] sm:$0xf]  ;;  %v3643_v36 = vld [vmem:[#allocation5 + $0x4f4] sm:$0xf0]  ;;  %v2515_v47 = vor.u32 %v3519_v33, %v2514_v29  ;;  %v3537_v29 = vld [vmem:[#allocation5 + $0x1ac] sm:$0xf] }
  0x7a   :  { %1482 = vmatpush.bf16.msrb.mxu0 %v3151_v12  ;;  %1444 = vmatmul.bf16.vlgmr.msra.gmra.mxu1 %v4000_v57  ;;  %v3591_v12 = vld [vmem:[#allocation5 + $0x354] sm:$0xf0]  ;;  %v2770_v40 = vld [vmem:[#allocation5 + $0x308] sm:$0xf]  ;;  %v3011_v48 = vor.u32 %v3643_v36, %v3010_v34 }
  0x7b   :  { %1488 = vmatpush.bf16.msrb.mxu1 %v2499_v6  ;;  %v3563_v6 = vld [vmem:[#allocation5 + $0x274] sm:$0xf0]  ;;  %v2803_v21 = vor.u32 %v3591_v12, %v2802_v11  ;;  %v2994_v49 = vld [vmem:[#allocation5 + $0x4c8] sm:$0xf] }
  0x7c   :  { %1469 = vmatpush.bf16.msrb.mxu2 %v3023_v15  ;;  %1457 = vmatmul.bf16.vlgmr.msra.gmra.mxu3 %v4012_v30  ;;  %v2691_v14 = vor.u32 %v3563_v6, %v2690_v5  ;;  %v2547_v15 = vor.u32 %v3527_v8, %v2546_v7  ;;  %v3675_v39 = vld [vmem:[#allocation5 + $0x5f4] sm:$0xf0]  ;;  %v3154_v56 = vld [vmem:[#allocation5 + $0x608] sm:$0xf]  ;;  %v3545_v5 = vld [vmem:[#allocation5 + $0x1ec] sm:$0xf] }
  0x7d   :  { %1501 = vmatpush.bf16.msrb.mxu3 %v2627_v10  ;;  %v2419_v10 = vor.u32 %v3495_v3, %v2418_v0  ;;  %v3583_v42 = vld [vmem:[#allocation5 + $0x314] sm:$0xf0]  ;;  %v3509_v0 = vld [vmem:[#allocation5 + $0xcc] sm:$0xf]  ;;  %v2628_v6 = vld [vmem:[#allocation5 + $0x1f8] sm:$0xf0] }
  0x7e   :  { %1514 = vmatpush.bf16.msra.mxu0 %v2755_v23  ;;  %v2403_v23 = vor.u32 %v3491_v16, %v2402_v13  ;;  %v3639_v54 = vld [vmem:[#allocation5 + $0x4d4] sm:$0xf0]  ;;  %v2771_v59 = vor.u32 %v3583_v42, %v2770_v40  ;;  %v2978_v8 = vld [vmem:[#allocation5 + $0x4a8] sm:$0xf]  ;;  %v3505_v13 = vld [vmem:[#allocation5 + $0xac] sm:$0xf] }
  0x7f   :  { %1489 = vmatpush.bf16.msrb.mxu1 %v2483_v19  ;;  %1470 = vmatmul.bf16.vlgmr.msrb.gmra.mxu2 %v4014_v35  ;;  %v2530_v19 = vld [vmem:[#allocation5 + $0x128] sm:$0xf]  ;;  %v3679_v58 = vld [vmem:[#allocation5 + $0x614] sm:$0xf0]  ;;  %v2468_v16 = vld [vmem:[#allocation5 + $0xb8] sm:$0xf0] }
  0x80   :  { %1527 = vmatpush.bf16.msra.mxu2 %v2883_v18  ;;  %v3559_v18 = vld [vmem:[#allocation5 + $0x254] sm:$0xf0]  ;;  %v2531_v28 = vor.u32 %v3523_v20, %v2530_v19  ;;  %v3155_v3 = vor.u32 %v3679_v58, %v3154_v56  ;;  %v2962_v20 = vld [vmem:[#allocation5 + $0x488] sm:$0xf]  ;;  %v2436_v42 = vld [vmem:[#allocation5 + $0x78] sm:$0xf0] }
  0x81   :  { %1502 = vmatpush.bf16.msrb.mxu3 %v2611_v24  ;;  %v3587_v24 = vld [vmem:[#allocation5 + $0x334] sm:$0xf0]  ;;  %v2675_v27 = vor.u32 %v3559_v18, %v2674_v17  ;;  %v3541_v17 = vld [vmem:[#allocation5 + $0x1cc] sm:$0xf]  ;;  %v2612_v18 = vld [vmem:[#allocation5 + $0x1d8] sm:$0xf0] }
  0x82   :  { %1515 = vmatpush.bf16.msra.mxu0 %v2739_v37  ;;  %v2787_v37 = vor.u32 %v3587_v24, %v2786_v22  ;;  %v3667_v11 = vld [vmem:[#allocation5 + $0x5b4] sm:$0xf0]  ;;  %v3090_v22 = vld [vmem:[#allocation5 + $0x588] sm:$0xf]  ;;  %v2471_v24 = vor.u32 %v3505_v13, %v2468_v16  ;;  %v2615_v26 = vor.u32 %v3541_v17, %v2612_v18  ;;  %v2420_v58 = vld [vmem:[#allocation5 + $0x58] sm:$0xf0] }
  0x83   :  { %1490 = vmatpush.bf16.msrb.mxu1 %v2467_v32  ;;  %v3555_v32 = vld [vmem:[#allocation5 + $0x234] sm:$0xf0]  ;;  %v2946_v33 = vld [vmem:[#allocation5 + $0x468] sm:$0xf]  ;;  %v2756_v16 = vld [vmem:[#allocation5 + $0x2f8] sm:$0xf0] }
  0x84   :  { %1528 = vmatpush.bf16.msra.mxu2 %v2867_v31  ;;  %v2658_v31 = vld [vmem:[#allocation5 + $0x228] sm:$0xf]  ;;  %v3627_v34 = vld [vmem:[#allocation5 + $0x474] sm:$0xf0]  ;;  %v3609_v18 = vld [vmem:[#allocation5 + $0x3ec] sm:$0xf] }
  0x85   :  { %1503 = vmatpush.bf16.msrb.mxu3 %v2595_v38  ;;  %v3138_v38 = vld [vmem:[#allocation5 + $0x5e8] sm:$0xf]  ;;  %v2659_v43 = vor.u32 %v3555_v32, %v2658_v31  ;;  %v2596_v31 = vld [vmem:[#allocation5 + $0x1b8] sm:$0xf0] }
  0x86   :  { %1516 = vmatpush.bf16.msra.mxu0 %v2723_v50  ;;  %v2642_v50 = vld [vmem:[#allocation5 + $0x208] sm:$0xf]  ;;  %v3139_v53 = vor.u32 %v3675_v39, %v3138_v38  ;;  %v3497_v39 = vld [vmem:[#allocation5 + $0x6c] sm:$0xf]  ;;  %v2599_v40 = vor.u32 %v3537_v29, %v2596_v31  ;;  %v2740_v31 = vld [vmem:[#allocation5 + $0x2d8] sm:$0xf0] }
  0x87   :  { %1491 = vmatpush.bf16.msrb.mxu1 %v2451_v46  ;;  %v2500_v46 = vld [vmem:[#allocation5 + $0xf8] sm:$0xf0]  ;;  %v3074_v36 = vld [vmem:[#allocation5 + $0x568] sm:$0xf] }
  0x88   :  { %1529 = vmatpush.bf16.msra.mxu2 %v2851_v44  ;;  %v3513_v44 = vld [vmem:[#allocation5 + $0xec] sm:$0xf]  ;;  %v3026_v13 = vld [vmem:[#allocation5 + $0x508] sm:$0xf] }
  0x89   :  { %1504 = vmatpush.bf16.msrb.mxu3 %v2579_v52  ;;  %3161 = vmatmul.msk.bf16.vlgmr.msrb.gmra.mxu0 %vm1302_vm0, %v4008_v45  ;;  %v3551_v52 = vld [vmem:[#allocation5 + $0x214] sm:$0xf0]  ;;  %v2503_v62 = vor.u32 %v3513_v44, %v2500_v46  ;;  %v2580_v44 = vld [vmem:[#allocation5 + $0x198] sm:$0xf0] }
  0x8a   :  { %1517 = vmatpush.bf16.msra.mxu0 %v2707_v1  ;;  %v2643_v63 = vor.u32 %v3551_v52, %v2642_v50  ;;  %v2995_v1 = vor.u32 %v3639_v54, %v2994_v49  ;;  %v3058_v49 = vld [vmem:[#allocation5 + $0x548] sm:$0xf]  ;;  %v3655_v50 = vld [vmem:[#allocation5 + $0x554] sm:$0xf0]  ;;  %v2439_v52 = vor.u32 %v3497_v39, %v2436_v42  ;;  %v3637_v39 = vld [vmem:[#allocation5 + $0x4cc] sm:$0xf] }
  0x8b   :  { %1492 = vmatpush.bf16.msrb.mxu1 %v2435_v61  ;;  %v3671_v61 = vld [vmem:[#allocation5 + $0x5d4] sm:$0xf0]  ;;  %v2996_v42 = vld [vmem:[#allocation5 + $0x4d8] sm:$0xf0] }
  0x8c   :  { %1530 = vmatpush.bf16.msra.mxu2 %v2835_v60  ;;  %v3122_v60 = vld [vmem:[#allocation5 + $0x5c8] sm:$0xf] }
  0x8d   :  { %1505 = vmatpush.bf16.msrb.mxu3 %v2563_v2  ;;  %v2484_v2 = vld [vmem:[#allocation5 + $0xd8] sm:$0xf0]  ;;  %v3123_v7 = vor.u32 %v3671_v61, %v3122_v60  ;;  %v3059_v61 = vor.u32 %v3655_v50, %v3058_v49 }
  0x8e   :  { %1518 = vmatpush.bf16.msra.mxu0 %v2691_v14  ;;  %v2487_v12 = vor.u32 %v3509_v0, %v2484_v2  ;;  %v2631_v14 = vor.u32 %v3545_v5, %v2628_v6  ;;  %v2564_v60 = vld [vmem:[#allocation5 + $0x178] sm:$0xf0]  ;;  %v3042_v0 = vld [vmem:[#allocation5 + $0x528] sm:$0xf] }
  0x8f   :  { %1493 = vmatpush.bf16.msrb.mxu1 %v2419_v10  ;;  %v3106_v10 = vld [vmem:[#allocation5 + $0x5a8] sm:$0xf]  ;;  %v2516_v49 = vld [vmem:[#allocation5 + $0x118] sm:$0xf0] }
  0x90   :  { %1531 = vmatpush.bf16.msra.mxu2 %v2819_v9  ;;  %v3635_v9 = vld [vmem:[#allocation5 + $0x4b4] sm:$0xf0]  ;;  %v3107_v19 = vor.u32 %v3667_v11, %v3106_v10  ;;  %v2898_v11 = vld [vmem:[#allocation5 + $0x408] sm:$0xf]  ;;  %v2852_v50 = vld [vmem:[#allocation5 + $0x3b8] sm:$0xf0] }
  0x91   :  { %1506 = vmatpush.bf16.msrb.mxu3 %v2547_v15  ;;  %v2979_v15 = vor.u32 %v3635_v9, %v2978_v8  ;;  %v3525_v8 = vld [vmem:[#allocation5 + $0x14c] sm:$0xf]  ;;  %v2548_v9 = vld [vmem:[#allocation5 + $0x158] sm:$0xf0] }
  0x92   :  { %1519 = vmatpush.bf16.msra.mxu0 %v2675_v27 }
  0x93   :  { %1494 = vmatpush.bf16.msrb.mxu1 %v2403_v23  ;;  %v3663_v23 = vld [vmem:[#allocation5 + $0x594] sm:$0xf0] }
  0x94   :  { %1532 = vmatpush.bf16.msra.mxu2 %v2803_v21  ;;  %v3631_v21 = vld [vmem:[#allocation5 + $0x494] sm:$0xf0]  ;;  %v3091_v32 = vor.u32 %v3663_v23, %v3090_v22  ;;  %v3485_v22 = vld [vmem:[#allocation5 + $0xc] sm:$0xf]  ;;  %v2388_v23 = vld [vmem:[#allocation5 + $0x18] sm:$0xf0] }
  0x95   :  { %1507 = vmatpush.bf16.msrb.mxu3 %v2531_v28  ;;  %v2963_v27 = vor.u32 %v3631_v21, %v2962_v20  ;;  %v2452_v28 = vld [vmem:[#allocation5 + $0x98] sm:$0xf0]  ;;  %v2551_v20 = vor.u32 %v3525_v8, %v2548_v9  ;;  %v3629_v8 = vld [vmem:[#allocation5 + $0x48c] sm:$0xf] }
  0x96   :  { %1520 = vmatpush.bf16.msra.mxu0 %v2659_v43  ;;  %v2455_v38 = vor.u32 %v3501_v25, %v2452_v28  ;;  %v3533_v43 = vld [vmem:[#allocation5 + $0x18c] sm:$0xf]  ;;  %v2964_v9 = vld [vmem:[#allocation5 + $0x498] sm:$0xf0] }
  0x97   :  { %1495 = vmatpush.bf16.msrb.mxu1 %v2387_v41  ;;  %v2947_v41 = vor.u32 %v3627_v34, %v2946_v33  ;;  %v2583_v54 = vor.u32 %v3533_v43, %v2580_v44  ;;  %v3573_v28 = vld [vmem:[#allocation5 + $0x2cc] sm:$0xf]  ;;  %v2532_v33 = vld [vmem:[#allocation5 + $0x138] sm:$0xf0]  ;;  %v2391_v34 = vor.u32 %v3485_v22, %v2388_v23 }
  0x98   :  { %1533 = vmatpush.bf16.msra.mxu2 %v2787_v37  ;;  %v3659_v37 = vld [vmem:[#allocation5 + $0x574] sm:$0xf0]  ;;  %v3569_v43 = vld [vmem:[#allocation5 + $0x2ac] sm:$0xf]  ;;  %v2724_v44 = vld [vmem:[#allocation5 + $0x2b8] sm:$0xf0] }
  0x99   :  { %1508 = vmatpush.bf16.msrb.mxu3 %v2515_v47  ;;  %v3075_v46 = vor.u32 %v3659_v37, %v3074_v36  ;;  %v2930_v47 = vld [vmem:[#allocation5 + $0x448] sm:$0xf]  ;;  %v3605_v36 = vld [vmem:[#allocation5 + $0x3cc] sm:$0xf]  ;;  %v2868_v37 = vld [vmem:[#allocation5 + $0x3d8] sm:$0xf0] }
  0x9a   :  { %1496 = vmatmul.bf16.vlgmr.msrb.gmra.mxu1 %v3998_v55  ;;  %1521 = vmatpush.bf16.msra.mxu0 %v2643_v63  ;;  %v3619_v63 = vld [vmem:[#allocation5 + $0x434] sm:$0xf0] }
  0x9b   :  { %1540 = vmatpush.bf16.msra.mxu1 %v3011_v48  ;;  %v3623_v48 = vld [vmem:[#allocation5 + $0x454] sm:$0xf0] }
  0x9c   :  { %1534 = vmatpush.bf16.msra.mxu2 %v2771_v59  ;;  %1509 = vmatmul.bf16.vlgmr.msrb.gmra.mxu3 %v4004_v4  ;;  %v2931_v56 = vor.u32 %v3623_v48, %v2930_v47  ;;  %v3529_v59 = vld [vmem:[#allocation5 + $0x16c] sm:$0xf] }
  0x9d   :  { %1553 = vmatpush.bf16.msra.mxu3 %v3139_v53  ;;  %1522 = vmatmul.bf16.vlgmr.msra.gmra.mxu0 %v3996_v51  ;;  %v3493_v53 = vld [vmem:[#allocation5 + $0x4c] sm:$0xf]  ;;  %v2567_v5 = vor.u32 %v3529_v59, %v2564_v60  ;;  %v2980_v60 = vld [vmem:[#allocation5 + $0x4b8] sm:$0xf0] }
  0x9e   :  { %1573 = vmatpush.bf16.msrb.mxu0 %v3155_v3  ;;  %v2423_v2 = vor.u32 %v3493_v53, %v2420_v58  ;;  %v3489_v3 = vld [vmem:[#allocation5 + $0x2c] sm:$0xf]  ;;  %v3140_v53 = vld [vmem:[#allocation5 + $0x5f8] sm:$0xf0] }
  0x9f   :  { %1541 = vmatpush.bf16.msra.mxu1 %v2995_v1  ;;  %1535 = vmatmul.bf16.vlgmr.msra.gmra.mxu2 %v4000_v57  ;;  %v3651_v1 = vld [vmem:[#allocation5 + $0x534] sm:$0xf0]  ;;  %v3601_v47 = vld [vmem:[#allocation5 + $0x3ac] sm:$0xf] }
  0xa0   :  { %1579 = vmatpush.bf16.msrb.mxu2 %v2503_v62  ;;  %v2914_v62 = vld [vmem:[#allocation5 + $0x428] sm:$0xf]  ;;  %v3043_v10 = vor.u32 %v3651_v1, %v3042_v0  ;;  %v3517_v48 = vld [vmem:[#allocation5 + $0x10c] sm:$0xf]  ;;  %v2708_v0 = vld [vmem:[#allocation5 + $0x298] sm:$0xf0] }
  0xa1   :  { %1554 = vmatpush.bf16.msra.mxu3 %v3123_v7  ;;  %v2915_v6 = vor.u32 %v3619_v63, %v2914_v62  ;;  %v2404_v7 = vld [vmem:[#allocation5 + $0x38] sm:$0xf0]  ;;  %v2519_v58 = vor.u32 %v3517_v48, %v2516_v49  ;;  %v3633_v59 = vld [vmem:[#allocation5 + $0x4ac] sm:$0xf]  ;;  %v4044_v49 = vld [vmem:[#allocation7] sm:$0xf] }
  0xa2   :  { %1592 = vmatpush.bf16.msra.mxu0 %v2631_v14  ;;  %v3647_v14 = vld [vmem:[#allocation5 + $0x514] sm:$0xf0]  ;;  %v2407_v17 = vor.u32 %v3489_v3, %v2404_v7  ;;  %v3565_v63 = vld [vmem:[#allocation5 + $0x28c] sm:$0xf] }
  0xa3   :  { %1542 = vmatpush.bf16.msra.mxu1 %v2979_v15  ;;  %v3577_v15 = vld [vmem:[#allocation5 + $0x2ec] sm:$0xf]  ;;  %v2711_v7 = vor.u32 %v3565_v63, %v2708_v0  ;;  %v3060_v0 = vld [vmem:[#allocation5 + $0x558] sm:$0xf0] }
  0xa4   :  { %1580 = vmatpush.bf16.msrb.mxu2 %v2487_v12  ;;  %v3615_v12 = vld [vmem:[#allocation5 + $0x414] sm:$0xf0]  ;;  %v2759_v25 = vor.u32 %v3577_v15, %v2756_v16  ;;  %v3597_v1 = vld [vmem:[#allocation5 + $0x38c] sm:$0xf]  ;;  %v2820_v15 = vld [vmem:[#allocation5 + $0x378] sm:$0xf0] }
  0xa5   :  { %1555 = vmatpush.bf16.msra.mxu3 %v3107_v19  ;;  %v2884_v19 = vld [vmem:[#allocation5 + $0x3f8] sm:$0xf0]  ;;  %v2899_v21 = vor.u32 %v3615_v12, %v2898_v11  ;;  %v3669_v3 = vld [vmem:[#allocation5 + $0x5cc] sm:$0xf] }
  0xa6   :  { %1593 = vmatpush.bf16.msra.mxu0 %v2615_v26  ;;  %v3641_v26 = vld [vmem:[#allocation5 + $0x4ec] sm:$0xf]  ;;  %v2887_v29 = vor.u32 %v3609_v18, %v2884_v19  ;;  %v2967_v18 = vor.u32 %v3629_v8, %v2964_v9 }
  0xa7   :  { %1543 = vmatpush.bf16.msra.mxu1 %v2963_v27  ;;  %v3012_v27 = vld [vmem:[#allocation5 + $0x4f8] sm:$0xf0]  ;;  %v3561_v12 = vld [vmem:[#allocation5 + $0x26c] sm:$0xf] }
  0xa8   :  { %1581 = vmatpush.bf16.msrb.mxu2 %v2471_v24  ;;  %v3027_v24 = vor.u32 %v3647_v14, %v3026_v13  ;;  %v3593_v13 = vld [vmem:[#allocation5 + $0x36c] sm:$0xf] }
  0xa9   :  { %1556 = vmatpush.bf16.msra.mxu3 %v3091_v32  ;;  %v3521_v32 = vld [vmem:[#allocation5 + $0x12c] sm:$0xf]  ;;  %v2823_v22 = vor.u32 %v3593_v13, %v2820_v15  ;;  %v3156_v15 = vld [vmem:[#allocation5 + $0x618] sm:$0xf0] }
  0xaa   :  { %1594 = vmatpush.bf16.msra.mxu0 %v2599_v40  ;;  %v2743_v40 = vor.u32 %v3573_v28, %v2740_v31  ;;  %v3665_v16 = vld [vmem:[#allocation5 + $0x5ac] sm:$0xf]  ;;  %v2804_v28 = vld [vmem:[#allocation5 + $0x358] sm:$0xf0] }
  0xab   :  { %1544 = vmatpush.bf16.msra.mxu1 %v2947_v41  ;;  %v2535_v41 = vor.u32 %v3521_v32, %v2532_v33  ;;  %v3092_v31 = vld [vmem:[#allocation5 + $0x598] sm:$0xf0]  ;;  %v3653_v63 = vld [vmem:[#allocation5 + $0x54c] sm:$0xf] }
  0xac   :  { %1582 = vmatpush.bf16.msrb.mxu2 %v2455_v38  ;;  %v3015_v38 = vor.u32 %v3641_v26, %v3012_v27  ;;  %v3589_v26 = vld [vmem:[#allocation5 + $0x34c] sm:$0xf] }
  0xad   :  { %1557 = vmatpush.bf16.msra.mxu3 %v3075_v46  ;;  %3162 = vmatmul.msk.bf16.vlgmr.msrb.gmra.mxu0 %vm1302_vm0, %v4008_v45  ;;  %v2871_v46 = vor.u32 %v3605_v36, %v2868_v37  ;;  %v2932_v36 = vld [vmem:[#allocation5 + $0x458] sm:$0xf0]  ;;  %v3613_v9 = vld [vmem:[#allocation5 + $0x40c] sm:$0xf] }
  0xae   :  { %1595 = vmatpush.bf16.msra.mxu0 %v2583_v54  ;;  %v2999_v54 = vor.u32 %v3637_v39, %v2996_v42  ;;  %v3585_v42 = vld [vmem:[#allocation5 + $0x32c] sm:$0xf] }
  0xaf   :  { %1545 = vmatpush.bf16.msra.mxu1 %v2931_v56  ;;  %v2727_v56 = vor.u32 %v3569_v43, %v2724_v44  ;;  %v2788_v43 = vld [vmem:[#allocation5 + $0x338] sm:$0xf0]  ;;  %v3657_v44 = vld [vmem:[#allocation5 + $0x56c] sm:$0xf] }
  0xb0   :  { %1583 = vmatpush.bf16.msrb.mxu2 %v2439_v52  ;;  %v3673_v52 = vld [vmem:[#allocation5 + $0x5ec] sm:$0xf] }
  0xb1   :  { %1558 = vmatpush.bf16.msra.mxu3 %v3059_v61  ;;  %v2855_v61 = vor.u32 %v3601_v47, %v2852_v50  ;;  %v3143_v62 = vor.u32 %v3673_v52, %v3140_v53  ;;  %v3617_v52 = vld [vmem:[#allocation5 + $0x42c] sm:$0xf]  ;;  %v2916_v53 = vld [vmem:[#allocation5 + $0x438] sm:$0xf0] }
  0xb2   :  { %1596 = vmatpush.bf16.msra.mxu0 %v2567_v5  ;;  %v3124_v5 = vld [vmem:[#allocation5 + $0x5d8] sm:$0xf0]  ;;  %v3677_v13 = vld [vmem:[#allocation5 + $0x60c] sm:$0xf] }
  0xb3   :  { %1546 = vmatpush.bf16.msra.mxu1 %v2915_v6  ;;  %v2983_v6 = vor.u32 %v3633_v59, %v2980_v60  ;;  %v3127_v11 = vor.u32 %v3669_v3, %v3124_v5  ;;  %v2644_v59 = vld [vmem:[#allocation5 + $0x218] sm:$0xf0]  ;;  %v3581_v60 = vld [vmem:[#allocation5 + $0x30c] sm:$0xf]  ;;  %v3286_v5 = vld [vmem:[#allocation8 + $0xf0] sm:$0xf] }
  0xb4   :  { %1584 = vmatpush.bf16.msrb.mxu2 %v2423_v2  ;;  %v2836_v2 = vld [vmem:[#allocation5 + $0x398] sm:$0xf0] }
  0xb5   :  { %1559 = vmatpush.bf16.msra.mxu3 %v3043_v10  ;;  %v2839_v10 = vor.u32 %v3597_v1, %v2836_v2  ;;  %v2919_v2 = vor.u32 %v3617_v52, %v2916_v53  ;;  %v3695_v3 = vld [vmem:[#allocation8 + $0x74] sm:$0xf0]  ;;  %v3190_v53 = vld [vmem:[#allocation8 + $0x30] sm:$0xf] }
  0xb6   :  { %1597 = vmatpush.bf16.msra.mxu0 %v2551_v20  ;;  %v4035_v14 = vpop.f32.mrf.mxu0  ;;  %v3625_v20 = vld [vmem:[#allocation5 + $0x46c] sm:$0xf] }
  0xb7   :  { %1547 = vmatpush.bf16.msra.mxu1 %v2899_v21  ;;  %v2948_v21 = vld [vmem:[#allocation5 + $0x478] sm:$0xf0] }
  0xb8   :  { %1585 = vmatpush.bf16.msrb.mxu2 %v2407_v17  ;;  %v3108_v17 = vld [vmem:[#allocation5 + $0x5b8] sm:$0xf0]  ;;  %v2951_v32 = vor.u32 %v3625_v20, %v2948_v21 }
  0xb9   :  { %1560 = vmatpush.bf16.msra.mxu3 %v3027_v24  ;;  %v3111_v23 = vor.u32 %v3665_v16, %v3108_v17  ;;  %v3557_v24 = vld [vmem:[#allocation5 + $0x24c] sm:$0xf] }
  0xba   :  { %1548 = vmatmul.bf16.vlgmr.msra.gmra.mxu1 %v4012_v30  ;;  %1598 = vmatpush.bf16.msra.mxu0 %v2535_v41  ;;  %v2660_v41 = vld [vmem:[#allocation5 + $0x238] sm:$0xf0] }
  0xbb   :  { %1605 = vmatpush.bf16.msrb.mxu1 %v2759_v25  ;;  %v2676_v25 = vld [vmem:[#allocation5 + $0x258] sm:$0xf0] }
  0xbc   :  { %1586 = vmatpush.bf16.msrb.mxu2 %v2391_v34  ;;  %1561 = vmatmul.bf16.vlgmr.msra.gmra.mxu3 %v4014_v35  ;;  %v2679_v33 = vor.u32 %v3557_v24, %v2676_v25  ;;  %v3621_v34 = vld [vmem:[#allocation5 + $0x44c] sm:$0xf]  ;;  %v3159_v24 = vor.u32 %v3677_v13, %v3156_v15  ;;  %v3278_v25 = vld [vmem:[#allocation8 + $0xe0] sm:$0xf] }
  0xbd   :  { %1618 = vmatpush.bf16.msrb.mxu3 %v2887_v29  ;;  %v4038_v27 = vpop.f32.mrf.mxu1  ;;  %v3661_v29 = vld [vmem:[#allocation5 + $0x58c] sm:$0xf]  ;;  %v2935_v48 = vor.u32 %v3621_v34, %v2932_v36  ;;  %v3206_v34 = vld [vmem:[#allocation8 + $0x50] sm:$0xf]  ;;  %v3691_v36 = vld [vmem:[#allocation8 + $0x54] sm:$0xf0] }
  0xbe   :  { %1599 = vmatpush.bf16.msra.mxu0 %v2519_v58  ;;  %v3095_v39 = vor.u32 %v3661_v29, %v3092_v31  ;;  %v1317_v47 = vpop.f32.mrf.mxu0  ;;  %v3166_v15 = vld [vmem:[#allocation8] sm:$0xf] }
  0xbf   :  { %1606 = vmatpush.bf16.msrb.mxu1 %v2743_v40  ;;  %1587 = vmatmul.bf16.vlgmr.msrb.gmra.mxu2 %v3998_v55  ;;  %v2692_v55 = vld [vmem:[#allocation5 + $0x278] sm:$0xf0]  ;;  %v3553_v40 = vld [vmem:[#allocation5 + $0x22c] sm:$0xf]  ;;  %v3262_v47 = vld [vmem:[#allocation8 + $0xc0] sm:$0xf] }
  0xc0   :  { %1631 = vmatpush.bf16.msra.mxu2 %v3015_v38  ;;  %v2695_v19 = vor.u32 %v3561_v12, %v2692_v55  ;;  %v2807_v38 = vor.u32 %v3589_v26, %v2804_v28  ;;  %v2663_v50 = vor.u32 %v3553_v40, %v2660_v41  ;;  %v3063_v55 = vor.u32 %v3653_v63, %v3060_v0  ;;  %v3709_v26 = vld [vmem:[#allocation8 + $0xe4] sm:$0xf0]  ;;  %v3270_v40 = vld [vmem:[#allocation8 + $0xd0] sm:$0xf] }
  0xc1   :  { %1619 = vmatpush.bf16.msrb.mxu3 %v2871_v46  ;;  %1600 = vmatmul.bf16.vlgmr.msra.gmra.mxu0 %v4004_v4  ;;  %v4040_v4 = vpop.f32.mrf.mxu2  ;;  %v4042_v37 = vpop.f32.mrf.mxu3  ;;  %v3076_v46 = vld [vmem:[#allocation5 + $0x578] sm:$0xf0]  ;;  %v3685_v63 = vld [vmem:[#allocation8 + $0x24] sm:$0xf0] }
  0xc2   :  { %1644 = vmatpush.bf16.msrb.mxu0 %v3143_v62  ;;  %v3079_v58 = vor.u32 %v3657_v44, %v3076_v46  ;;  %v3222_v62 = vld [vmem:[#allocation8 + $0x70] sm:$0xf]  ;;  %v3198_v44 = vld [vmem:[#allocation8 + $0x40] sm:$0xf] }
  0xc3   :  { %1607 = vmatpush.bf16.msrb.mxu1 %v2727_v56  ;;  %v2791_v56 = vor.u32 %v3585_v42, %v2788_v43  ;;  %v3223_v17 = vor.u32 %v3695_v3, %v3222_v62  ;;  %v3207_v43 = vor.u32 %v3691_v36, %v3206_v34  ;;  %v3708_v34 = vld [vmem:[#allocation8 + $0xe4] sm:$0xf]  ;;  %v3280_v36 = vld [vmem:[#allocation8 + $0xe8] sm:$0xf0] }
  0xc4   :  { %1632 = vmatpush.bf16.msra.mxu2 %v2999_v54  ;;  %v3549_v54 = vld [vmem:[#allocation5 + $0x20c] sm:$0xf] }
  0xc5   :  { %1620 = vmatpush.bf16.msrb.mxu3 %v2855_v61  ;;  %v2772_v61 = vld [vmem:[#allocation5 + $0x318] sm:$0xf0]  ;;  %v1330_v1 = vpop.f32.mrf.mxu1  ;;  %v2647_v8 = vor.u32 %v3549_v54, %v2644_v59 }
  0xc6   :  { %1645 = vmatpush.bf16.msrb.mxu0 %v3127_v11  ;;  %v314_v11 = vperm.slane %v4044_v49, 0  ;;  %v2775_v12 = vor.u32 %v3581_v60, %v2772_v61  ;;  %v3703_v59 = vld [vmem:[#allocation8 + $0xb4] sm:$0xf0]  ;;  %v3246_v1 = vld [vmem:[#allocation8 + $0xa0] sm:$0xf] }
  0xc7   :  { %1608 = vmatpush.bf16.msrb.mxu1 %v2711_v7 }
  0xc8   :  { %1633 = vmatpush.bf16.msra.mxu2 %v2983_v6  ;;  %v3711_v6 = vld [vmem:[#allocation8 + $0xf4] sm:$0xf0]  ;;  %v1316_v28 = vadd.f32 %v4035_v14, %v314_v11 }
  0xc9   :  { %1621 = vmatpush.bf16.msrb.mxu3 %v2839_v10  ;;  %v1343_v7 = vpop.f32.mrf.mxu2  ;;  %v2900_v10 = vld [vmem:[#allocation5 + $0x418] sm:$0xf0]  ;;  %v1356_v16 = vpop.f32.mrf.mxu3  ;;  %v3287_v20 = vor.u32 %v3711_v6, %v3286_v5  ;;  %v3174_v6 = vld [vmem:[#allocation8 + $0x10] sm:$0xf] }
  0xca   :  { %1646 = vmatpush.bf16.msrb.mxu0 %v3111_v23  ;;  %v2903_v21 = vor.u32 %v3613_v9, %v2900_v10  ;;  %v3693_v23 = vld [vmem:[#allocation8 + $0x64] sm:$0xf0]  ;;  %v3707_v14 = vld [vmem:[#allocation8 + $0xd4] sm:$0xf0]  ;;  %v1329_v41 = vadd.f32 %v4038_v27, %v1316_v28 }
  0xcb   :  { %1609 = vmatpush.bf16.msrb.mxu1 %v2695_v19  ;;  %v3044_v19 = vld [vmem:[#allocation5 + $0x538] sm:$0xf0]  ;;  %v3271_v46 = vor.u32 %v3707_v14, %v3270_v40  ;;  %v3681_v16 = vld [vmem:[#allocation8 + $0x4] sm:$0xf0]  ;;  %v3690_v14 = vld [vmem:[#allocation8 + $0x54] sm:$0xf] }
  0xcc   :  { %1634 = vmatpush.bf16.msra.mxu2 %v2967_v18  ;;  %v3649_v18 = vld [vmem:[#allocation5 + $0x52c] sm:$0xf]  ;;  %v3687_v27 = vld [vmem:[#allocation8 + $0x34] sm:$0xf0] }
  0xcd   :  { %1622 = vmatpush.bf16.msrb.mxu3 %v2823_v22  ;;  %v3214_v22 = vld [vmem:[#allocation8 + $0x60] sm:$0xf]  ;;  %v3047_v29 = vor.u32 %v3649_v18, %v3044_v19  ;;  %v3191_v61 = vor.u32 %v3687_v27, %v3190_v53  ;;  %v3683_v7 = vld [vmem:[#allocation8 + $0x14] sm:$0xf0]  ;;  %v3224_v19 = vld [vmem:[#allocation8 + $0x78] sm:$0xf0] }
  0xce   :  { %1647 = vmatpush.bf16.msrb.mxu0 %v3095_v39  ;;  %v3215_v31 = vor.u32 %v3693_v23, %v3214_v22  ;;  %v3699_v11 = vld [vmem:[#allocation8 + $0x94] sm:$0xf0]  ;;  %v3710_v22 = vld [vmem:[#allocation8 + $0xf4] sm:$0xf]  ;;  %v3288_v23 = vld [vmem:[#allocation8 + $0xf8] sm:$0xf0] }
  0xcf   :  { %1610 = vmatpush.bf16.msrb.mxu1 %v2679_v33  ;;  %v3028_v33 = vld [vmem:[#allocation5 + $0x518] sm:$0xf0]  ;;  %v3688_v53 = vld [vmem:[#allocation8 + $0x44] sm:$0xf]  ;;  %v3200_v27 = vld [vmem:[#allocation8 + $0x48] sm:$0xf0] }
  0xd0   :  { %1635 = vmatpush.bf16.msra.mxu2 %v2951_v32  ;;  %v3645_v32 = vld [vmem:[#allocation5 + $0x50c] sm:$0xf] }
  0xd1   :  { %1623 = vmatpush.bf16.msrb.mxu3 %v2807_v38  ;;  %v3279_v38 = vor.u32 %v3709_v26, %v3278_v25  ;;  %v1393_v39 = vpop.f32.mrf.mxu2  ;;  %v3031_v42 = vor.u32 %v3645_v32, %v3028_v33  ;;  %v3291_v32 = vor.u32 %v3710_v22, %v3288_v23  ;;  %v3240_v22 = vld [vmem:[#allocation8 + $0x98] sm:$0xf0] }
  0xd2   :  { %1648 = vmatpush.bf16.msrb.mxu0 %v3079_v58  ;;  %v3254_v58 = vld [vmem:[#allocation8 + $0xb0] sm:$0xf] }
  0xd3   :  { %1611 = vmatpush.bf16.msrb.mxu1 %v2663_v50  ;;  %v3255_v0 = vor.u32 %v3703_v59, %v3254_v58  ;;  %v3264_v58 = vld [vmem:[#allocation8 + $0xc8] sm:$0xf0]  ;;  %v3334_v59 = vld [vmem:[#allocation8 + $0x150] sm:$0xf] }
  0xd4   :  { %1636 = vmatpush.bf16.msra.mxu2 %v2935_v48  ;;  %v3705_v48 = vld [vmem:[#allocation8 + $0xc4] sm:$0xf0] }
  0xd5   :  { %1624 = vmatpush.bf16.msrb.mxu3 %v2791_v56  ;;  %v3263_v54 = vor.u32 %v3705_v48, %v3262_v47 }
  0xd6   :  { %1649 = vmatpush.bf16.msrb.mxu0 %v3063_v55  ;;  %v1367_v52 = vpop.f32.mrf.mxu0  ;;  %v3175_v55 = vor.u32 %v3683_v7, %v3174_v6 }
  0xd7   :  { %1612 = vmatpush.bf16.msrb.mxu1 %v2647_v8  ;;  %v1380_v56 = vpop.f32.mrf.mxu1 }
  0xd8   :  { %1637 = vmatpush.bf16.msra.mxu2 %v2919_v2  ;;  %v3701_v2 = vld [vmem:[#allocation8 + $0xa4] sm:$0xf0] }
  0xd9   :  { %1625 = vmatpush.bf16.msrb.mxu3 %v2775_v12  ;;  %v3247_v9 = vor.u32 %v3701_v2, %v3246_v1 }
  0xda   :  { %1613 = vmatmul.bf16.vlgmr.msrb.gmra.mxu1 %v3996_v51  ;;  %1650 = vmatpush.bf16.msrb.mxu0 %v3047_v29  ;;  %v3689_v51 = vld [vmem:[#allocation8 + $0x44] sm:$0xf0] }
  0xdb   :  { %2081 = vmatpush.bf16.msra.mxu1 %v3287_v20  ;;  %v3199_v50 = vor.u32 %v3689_v51, %v3198_v44  ;;  %v3230_v20 = vld [vmem:[#allocation8 + $0x80] sm:$0xf]  ;;  %v3706_v44 = vld [vmem:[#allocation8 + $0xd4] sm:$0xf]  ;;  %v3272_v51 = vld [vmem:[#allocation8 + $0xd8] sm:$0xf0] }
  0xdc   :  { %1638 = vmatpush.bf16.msra.mxu2 %v2903_v21  ;;  %1626 = vmatmul.bf16.vlgmr.msrb.gmra.mxu3 %v4000_v57  ;;  %v1342_v57 = vadd.f32 %v4040_v4, %v1329_v41  ;;  %v3182_v4 = vld [vmem:[#allocation8 + $0x20] sm:$0xf]  ;;  %v3697_v21 = vld [vmem:[#allocation8 + $0x84] sm:$0xf0]  ;;  %v3208_v41 = vld [vmem:[#allocation8 + $0x58] sm:$0xf0] }
  0xdd   :  { %2068 = vmatpush.bf16.msra.mxu3 %v3223_v17  ;;  %v3183_v3 = vor.u32 %v3685_v63, %v3182_v4  ;;  %v3694_v17 = vld [vmem:[#allocation8 + $0x74] sm:$0xf]  ;;  %v3231_v29 = vor.u32 %v3697_v21, %v3230_v20  ;;  %v3192_v63 = vld [vmem:[#allocation8 + $0x38] sm:$0xf0]  ;;  %v3721_v20 = vld [vmem:[#allocation8 + $0x144] sm:$0xf0] }
  0xde   :  { %1651 = vmatpush.bf16.msrb.mxu0 %v3031_v42  ;;  %v1355_v60 = vadd.f32 %v4042_v37, %v1342_v57  ;;  %v3238_v37 = vld [vmem:[#allocation8 + $0x90] sm:$0xf]  ;;  %v3227_v26 = vor.u32 %v3694_v17, %v3224_v19  ;;  %v3283_v42 = vor.u32 %v3708_v34, %v3280_v36  ;;  %v3342_v57 = vld [vmem:[#allocation8 + $0x160] sm:$0xf]  ;;  %v3686_v4 = vld [vmem:[#allocation8 + $0x34] sm:$0xf] }
  0xdf   :  { %1639 = vmatmul.bf16.vlgmr.msra.gmra.mxu2 %v4012_v30  ;;  %2082 = vmatpush.bf16.msra.mxu1 %v3279_v38  ;;  %v1395_v30 = vpop.f32.mrf.mxu2  ;;  %v1406_v8 = vpop.f32.mrf.mxu3  ;;  %v3239_v18 = vor.u32 %v3699_v11, %v3238_v37  ;;  %v315_v38 = vperm.slane %v4044_v49, 1  ;;  %v3195_v7 = vor.u32 %v3686_v4, %v3192_v63  ;;  %v3700_v37 = vld [vmem:[#allocation8 + $0xa4] sm:$0xf]  ;;  %v3248_v11 = vld [vmem:[#allocation8 + $0xa8] sm:$0xf0] }
  0xe0   :  { %1664 = vmatpush.bf16.msrb.mxu2 %v3159_v24  ;;  %v1368_v62 = vadd.f32 %v1367_v52, %v1355_v60  ;;  %v1382_v10 = vpop.f32.mrf.mxu1  ;;  %v3167_v24 = vor.u32 %v3681_v16, %v3166_v15  ;;  %v3211_v52 = vor.u32 %v3690_v14, %v3208_v41  ;;  %v3723_v60 = vld [vmem:[#allocation8 + $0x154] sm:$0xf0]  ;;  %v3176_v15 = vld [vmem:[#allocation8 + $0x18] sm:$0xf0]  ;;  %v3251_v17 = vor.u32 %v3700_v37, %v3248_v11  ;;  %v3326_v19 = vld [vmem:[#allocation8 + $0x140] sm:$0xf] }
  0xe1   :  { %2069 = vmatpush.bf16.msra.mxu3 %v3215_v31  ;;  %1652 = vmatmul.bf16.vlgmr.msrb.gmra.mxu0 %v4014_v35  ;;  %v1369_v35 = vpop.f32.mrf.mxu0  ;;  %v3216_v31 = vld [vmem:[#allocation8 + $0x68] sm:$0xf0]  ;;  %v1407_v47 = vadd.f32 %v1406_v8, %v315_v38  ;;  %v3335_v1 = vor.u32 %v3723_v60, %v3334_v59  ;;  %v3327_v23 = vor.u32 %v3721_v20, %v3326_v19  ;;  %v3310_v34 = vld [vmem:[#allocation8 + $0x120] sm:$0xf]  ;;  %v3717_v36 = vld [vmem:[#allocation8 + $0x124] sm:$0xf0] }
  0xe2   :  { %v1381_v5 = vadd.f32 %v1380_v56, %v1368_v62  ;;  %v3704_v56 = vld [vmem:[#allocation8 + $0xc4] sm:$0xf]  ;;  %v3203_v62 = vor.u32 %v3688_v53, %v3200_v27  ;;  %v3184_v8 = vld [vmem:[#allocation8 + $0x28] sm:$0xf0]  ;;  %v3294_v27 = vld [vmem:[#allocation8 + $0x100] sm:$0xf] }
  0xe3   :  { %2083 = vmatpush.bf16.msra.mxu1 %v3271_v46  ;;  %v3727_v46 = vld [vmem:[#allocation8 + $0x174] sm:$0xf0]  ;;  %v3684_v35 = vld [vmem:[#allocation8 + $0x24] sm:$0xf]  ;;  %v3232_v14 = vld [vmem:[#allocation8 + $0x88] sm:$0xf0] }
  0xe4   :  { %v1394_v13 = vadd.f32 %v1393_v39, %v1381_v5  ;;  %v3256_v5 = vld [vmem:[#allocation8 + $0xb8] sm:$0xf0]  ;;  %v3726_v59 = vld [vmem:[#allocation8 + $0x174] sm:$0xf]  ;;  %v3344_v4 = vld [vmem:[#allocation8 + $0x168] sm:$0xf0] }
  0xe5   :  { %2070 = vmatpush.bf16.msra.mxu3 %v3207_v43  ;;  %v3350_v43 = vld [vmem:[#allocation8 + $0x170] sm:$0xf]  ;;  %v3352_v60 = vld [vmem:[#allocation8 + $0x178] sm:$0xf0]  ;;  %v3741_v20 = vld [vmem:[#allocation8 + $0x1e4] sm:$0xf0] }
  0xe6   :  { %v1670_v25 = vmax.f32 %v1394_v13, 0.0  ;;  %v3351_v48 = vor.u32 %v3727_v46, %v3350_v43  ;;  %v3682_v13 = vld [vmem:[#allocation8 + $0x14] sm:$0xf]  ;;  %v3311_v43 = vor.u32 %v3717_v36, %v3310_v34  ;;  %v3302_v46 = vld [vmem:[#allocation8 + $0x110] sm:$0xf] }
  0xe7   :  { %2084 = vmatpush.bf16.msra.mxu1 %v3263_v54  ;;  %v1419_v12 = vpop.f32.mrf.mxu2  ;;  %v1408_v28 = vpop.f32.mrf.mxu3  ;;  %v3275_v54 = vor.u32 %v3706_v44, %v3272_v51  ;;  %v3320_v37 = vld [vmem:[#allocation8 + $0x138] sm:$0xf0] }
  0xe8   :  { %v4058_v39 = vpack.c.bf16 %v1670_v25, %v1670_v25  ;;  %2094 = vmatpush.bf16.msra.mxu2 %v3351_v48  ;;  %v3719_v25 = vld [vmem:[#allocation8 + $0x134] sm:$0xf0] }
  0xe9   :  { %2071 = vmatpush.bf16.msra.mxu3 %v3199_v50  ;;  %v3725_v50 = vld [vmem:[#allocation8 + $0x164] sm:$0xf0] }
  0xea   :  { %v3343_v30 = vor.u32 %v3725_v50, %v3342_v57 }
  0xeb   :  { %2085 = vmatpush.bf16.msra.mxu1 %v3255_v0  ;;  %v3267_v0 = vor.u32 %v3704_v56, %v3264_v58 }
  0xec   :  { %2095 = vmatpush.bf16.msra.mxu2 %v3343_v30 }
  0xed   :  { %2072 = vmatpush.bf16.msra.mxu3 %v3191_v61  ;;  %v1420_v61 = vadd.f32 %v1419_v12, %v1407_v47  ;;  %v3715_v47 = vld [vmem:[#allocation8 + $0x114] sm:$0xf0] }
  0xef   :  { %3163 = vmatmul.msk.bf16.vlgmr.msrb.gmra.mxu2 %vm1302_vm0, %v4008_v45  ;;  %2086 = vmatpush.bf16.msra.mxu1 %v3247_v9  ;;  %v3692_v45 = vld [vmem:[#allocation8 + $0x64] sm:$0xf]  ;;  %v1421_v33 = vpop.f32.mrf.mxu2 }
  0xf0   :  { %v3219_v40 = vor.u32 %v3692_v45, %v3216_v31  ;;  %2096 = vmatpush.bf16.msra.mxu2 %v3335_v1  ;;  %v3680_v45 = vld [vmem:[#allocation8 + $0x4] sm:$0xf]  ;;  %v3722_v1 = vld [vmem:[#allocation8 + $0x154] sm:$0xf] }
  0xf1   :  { %2073 = vmatpush.bf16.msra.mxu3 %v3183_v3  ;;  %v3702_v3 = vld [vmem:[#allocation8 + $0xb4] sm:$0xf] }
  0xf2   :  { %v3259_v9 = vor.u32 %v3702_v3, %v3256_v5 }
  0xf3   :  { %2087 = vmatpush.bf16.msra.mxu1 %v3239_v18  ;;  %v3698_v18 = vld [vmem:[#allocation8 + $0x94] sm:$0xf] }
  0xf4   :  { %2097 = vmatpush.bf16.msra.mxu2 %v3327_v23  ;;  %v3243_v33 = vor.u32 %v3698_v18, %v3240_v22  ;;  %v3406_v18 = vld [vmem:[#allocation8 + $0x1e0] sm:$0xf]  ;;  %v3714_v22 = vld [vmem:[#allocation8 + $0x114] sm:$0xf]  ;;  %v3304_v23 = vld [vmem:[#allocation8 + $0x118] sm:$0xf0] }
  0xf5   :  { %2074 = vmatpush.bf16.msra.mxu3 %v3175_v55  ;;  %v3187_v55 = vor.u32 %v3684_v35, %v3184_v8 }
  0xf6   :  { %v1432_v2 = vpop.f32.mrf.mxu0 }
  0xf7   :  { %2088 = vmatpush.bf16.msra.mxu1 %v3231_v29  ;;  %v1433_v6 = vadd.f32 %v1432_v2, %v1420_v61  ;;  %v1445_v10 = vpop.f32.mrf.mxu1  ;;  %v3179_v29 = vor.u32 %v3682_v13, %v3176_v15  ;;  %v3355_v61 = vor.u32 %v3726_v59, %v3352_v60  ;;  %v3336_v2 = vld [vmem:[#allocation8 + $0x158] sm:$0xf0]  ;;  %v3743_v13 = vld [vmem:[#allocation8 + $0x1f4] sm:$0xf0] }
  0xf8   :  { %v3339_v5 = vor.u32 %v3722_v1, %v3336_v2 }
  0xf9   :  { %2075 = vmatpush.bf16.msra.mxu3 %v3167_v24  ;;  %v1446_v12 = vadd.f32 %v1445_v10, %v1433_v6  ;;  %v3318_v24 = vld [vmem:[#allocation8 + $0x130] sm:$0xf]  ;;  %v3328_v6 = vld [vmem:[#allocation8 + $0x148] sm:$0xf0]  ;;  %v3718_v10 = vld [vmem:[#allocation8 + $0x134] sm:$0xf] }
  0xfa   :  { %v3319_v31 = vor.u32 %v3719_v25, %v3318_v24  ;;  %v3398_v24 = vld [vmem:[#allocation8 + $0x1d0] sm:$0xf]  ;;  %v3739_v25 = vld [vmem:[#allocation8 + $0x1d4] sm:$0xf0] }
  0xfb   :  { %2133 = vmatpush.bf16.msrb.mxu1 %v3291_v32  ;;  %v3168_v32 = vld [vmem:[#allocation8 + $0x8] sm:$0xf0] }
  0xfc   :  { %2076 = vmatmul.bf16.vlgmr.msra.gmra.mxu3 %v4058_v39  ;;  %2098 = vmatpush.bf16.msra.mxu2 %v3319_v31  ;;  %v3399_v31 = vor.u32 %v3739_v25, %v3398_v24  ;;  %v3730_v25 = vld [vmem:[#allocation8 + $0x194] sm:$0xf] }
  0xfd   :  { %2120 = vmatpush.bf16.msrb.mxu3 %v3227_v26 }
  0xfe   :  { %v1434_v21 = vpop.f32.mrf.mxu0 }
  0xff   :  { %2134 = vmatpush.bf16.msrb.mxu1 %v3283_v42  ;;  %v1458_v16 = vpop.f32.mrf.mxu3  ;;  %v1447_v38 = vpop.f32.mrf.mxu1  ;;  %v3171_v42 = vor.u32 %v3680_v45, %v3168_v32  ;;  %v3407_v21 = vor.u32 %v3741_v20, %v3406_v18  ;;  %v3307_v45 = vor.u32 %v3714_v22, %v3304_v23  ;;  %v3712_v32 = vld [vmem:[#allocation8 + $0x104] sm:$0xf]  ;;  %v3384_v18 = vld [vmem:[#allocation8 + $0x1b8] sm:$0xf0]  ;;  %v3376_v22 = vld [vmem:[#allocation8 + $0x1a8] sm:$0xf0] }
 0x100   :  { %v1459_v26 = vadd.f32 %v1458_v16, %v1446_v12  ;;  %2099 = vmatpush.bf16.msra.mxu2 %v3311_v43  ;;  %v3323_v12 = vor.u32 %v3718_v10, %v3320_v37  ;;  %v3716_v16 = vld [vmem:[#allocation8 + $0x124] sm:$0xf]  ;;  %v317_v23 = vperm.slane %v4044_v49, 3 }
 0x101   :  { %2121 = vmatpush.bf16.msrb.mxu3 %v3219_v40  ;;  %v3696_v40 = vld [vmem:[#allocation8 + $0x84] sm:$0xf] }
 0x102   :  { %v1471_v28 = vpop.f32.mrf.mxu2  ;;  %v3235_v44 = vor.u32 %v3696_v40, %v3232_v14  ;;  %v3390_v40 = vld [vmem:[#allocation8 + $0x1c0] sm:$0xf]  ;;  %v3737_v14 = vld [vmem:[#allocation8 + $0x1c4] sm:$0xf0] }
 0x103   :  { %2135 = vmatpush.bf16.msrb.mxu1 %v3275_v54  ;;  %v1472_v41 = vadd.f32 %v1471_v28, %v1459_v26  ;;  %v3713_v54 = vld [vmem:[#allocation8 + $0x104] sm:$0xf0]  ;;  %v316_v26 = vperm.slane %v4044_v49, 2 }
 0x104   :  { %v3295_v30 = vor.u32 %v3713_v54, %v3294_v27 }
 0x105   :  { %2122 = vmatpush.bf16.msrb.mxu3 %v3211_v52  ;;  %v3303_v52 = vor.u32 %v3715_v47, %v3302_v46 }
 0x106   :  { %v1484_v48 = vpop.f32.mrf.mxu0 }
 0x107   :  { %2136 = vmatpush.bf16.msrb.mxu1 %v3267_v0  ;;  %v1460_v51 = vpop.f32.mrf.mxu3  ;;  %v1485_v57 = vadd.f32 %v1484_v48, %v1472_v41  ;;  %2100 = vmatpush.bf16.msra.mxu2 %v3303_v52 }
 0x108   :  { %v3735_v51 = vld [vmem:[#allocation8 + $0x1b4] sm:$0xf0] }
 0x109   :  { %2123 = vmatpush.bf16.msrb.mxu3 %v3203_v62  ;;  %v1671_v53 = vmax.f32 %v1485_v57, 0.0  ;;  %v3724_v62 = vld [vmem:[#allocation8 + $0x164] sm:$0xf]  ;;  %v3374_v57 = vld [vmem:[#allocation8 + $0x1a0] sm:$0xf] }
 0x10a   :  { %v1473_v50 = vpop.f32.mrf.mxu2  ;;  %v3347_v63 = vor.u32 %v3724_v62, %v3344_v4  ;;  %v3358_v4 = vld [vmem:[#allocation8 + $0x180] sm:$0xf] }
 0x10b   :  { %2137 = vmatpush.bf16.msrb.mxu1 %v3259_v9  ;;  %v1675_v56 = vpack.c.bf16 %v1671_v53, %v1671_v53  ;;  %2101 = vmatpush.bf16.msra.mxu2 %v3295_v30  ;;  %v3733_v50 = vld [vmem:[#allocation8 + $0x1a4] sm:$0xf0]  ;;  %v3731_v30 = vld [vmem:[#allocation8 + $0x194] sm:$0xf0] }
 0x10c   :  { %v3375_v53 = vor.u32 %v3733_v50, %v3374_v57 }
 0x10d   :  { %2124 = vmatpush.bf16.msrb.mxu3 %v3195_v7  ;;  %2089 = vmatmul.bf16.vlgmr.msra.gmra.mxu1 %v1675_v56 }
 0x10e   :  { %v1486_v58 = vpop.f32.mrf.mxu0 }
 0x10f   :  { %2138 = vmatpush.bf16.msrb.mxu1 %v3251_v17  ;;  %2146 = vmatpush.bf16.msrb.mxu2 %v3355_v61  ;;  %v3312_v17 = vld [vmem:[#allocation8 + $0x128] sm:$0xf0] }
 0x110   :  { %v3315_v19 = vor.u32 %v3716_v16, %v3312_v17  ;;  %v3734_v17 = vld [vmem:[#allocation8 + $0x1b4] sm:$0xf] }
 0x111   :  { %2125 = vmatpush.bf16.msrb.mxu3 %v3187_v55  ;;  %v3414_v55 = vld [vmem:[#allocation8 + $0x1f0] sm:$0xf]  ;;  %v3387_v20 = vor.u32 %v3734_v17, %v3384_v18  ;;  %v3753_v17 = vld [vmem:[#allocation10 + $0x48] sm:$0xff] }
 0x112   :  { %v3415_v15 = vor.u32 %v3743_v13, %v3414_v55  ;;  %v3736_v13 = vld [vmem:[#allocation8 + $0x1c4] sm:$0xf] }
 0x113   :  { %2139 = vmatpush.bf16.msrb.mxu1 %v3243_v33  ;;  %2147 = vmatpush.bf16.msrb.mxu2 %v3347_v63  ;;  %v3296_v33 = vld [vmem:[#allocation8 + $0x108] sm:$0xf0]  ;;  %v3729_v63 = vld [vmem:[#allocation8 + $0x184] sm:$0xf0] }
 0x114   :  { %2107 = vmatpush.bf16.msra.mxu0 %v3415_v15  ;;  %v3299_v38 = vor.u32 %v3712_v32, %v3296_v33  ;;  %v3359_v1 = vor.u32 %v3729_v63, %v3358_v4  ;;  %v3392_v15 = vld [vmem:[#allocation8 + $0x1c8] sm:$0xf0] }
 0x115   :  { %2126 = vmatpush.bf16.msrb.mxu3 %v3179_v29  ;;  %v3395_v16 = vor.u32 %v3736_v13, %v3392_v15  ;;  %v3755_v13 = vld [vmem:[#allocation10 + $0x58] sm:$0xff] }
 0x117   :  { %2140 = vmatpush.bf16.msrb.mxu1 %v3235_v44  ;;  %v1497_v0 = vpop.f32.mrf.mxu1  ;;  %2148 = vmatpush.bf16.msrb.mxu2 %v3339_v5  ;;  %v3382_v44 = vld [vmem:[#allocation8 + $0x1b0] sm:$0xf]  ;;  %v3416_v5 = vld [vmem:[#allocation8 + $0x1f8] sm:$0xf0] }
 0x118   :  { %2108 = vmatpush.bf16.msra.mxu0 %v3407_v21  ;;  %v1498_v36 = vadd.f32 %v1497_v0, %v316_v26  ;;  %v3383_v48 = vor.u32 %v3735_v51, %v3382_v44  ;;  %v3732_v21 = vld [vmem:[#allocation8 + $0x1a4] sm:$0xf]  ;;  %v3368_v26 = vld [vmem:[#allocation8 + $0x198] sm:$0xf0] }
 0x119   :  { %2127 = vmatpush.bf16.msrb.mxu3 %v3171_v42  ;;  %v3391_v42 = vor.u32 %v3737_v14, %v3390_v40  ;;  %v3379_v24 = vor.u32 %v3732_v21, %v3376_v22 }
 0x11a   :  { %v1523_v3 = vpop.f32.mrf.mxu0 }
 0x11c   :  { %2128 = vmatmul.bf16.vlgmr.msrb.gmra.mxu3 %v4058_v39  ;;  %v3720_v39 = vld [vmem:[#allocation8 + $0x144] sm:$0xf]  ;;  %2109 = vmatpush.bf16.msra.mxu0 %v3399_v31 }
 0x11d   :  { %v3331_v35 = vor.u32 %v3720_v39, %v3328_v6  ;;  %2141 = vmatmul.bf16.vlgmr.msrb.gmra.mxu1 %v1675_v56  ;;  %v3366_v56 = vld [vmem:[#allocation8 + $0x190] sm:$0xf] }
 0x11e   :  { %v3367_v60 = vor.u32 %v3731_v30, %v3366_v56 }
 0x11f   :  { %v1499_v7 = vpop.f32.mrf.mxu1  ;;  %v1510_v9 = vpop.f32.mrf.mxu3  ;;  %2149 = vmatpush.bf16.msrb.mxu2 %v3331_v35  ;;  %v3408_v35 = vld [vmem:[#allocation8 + $0x1e8] sm:$0xf0] }
 0x120   :  { %v1511_v41 = vadd.f32 %v1510_v9, %v1498_v36  ;;  %2110 = vmatpush.bf16.msra.mxu0 %v3391_v42  ;;  %v3740_v7 = vld [vmem:[#allocation8 + $0x1e4] sm:$0xf]  ;;  %v3360_v36 = vld [vmem:[#allocation8 + $0x188] sm:$0xf0] }
 0x121   :  { %v3411_v9 = vor.u32 %v3740_v7, %v3408_v35  ;;  %v3758_v7 = vld [vmem:[#allocation10 + $0x70] sm:$0xff]  ;;  %v3747_v35 = vld [vmem:[#allocation10 + $0x18] sm:$0xff] }
 0x122   :  { %v1536_v8 = vpop.f32.mrf.mxu2  ;;  %v1525_v11 = vpop.f32.mrf.mxu0  ;;  %v1524_v46 = vadd.f32 %v1523_v3, %v1511_v41  ;;  %v3742_v3 = vld [vmem:[#allocation8 + $0x1f4] sm:$0xf] }
 0x123   :  { %2150 = vmatpush.bf16.msrb.mxu2 %v3323_v12  ;;  %v3419_v39 = vor.u32 %v3742_v3, %v3416_v5  ;;  %v3738_v11 = vld [vmem:[#allocation8 + $0x1d4] sm:$0xf]  ;;  %v3400_v12 = vld [vmem:[#allocation8 + $0x1d8] sm:$0xf0]  ;;  %v3749_v5 = vld [vmem:[#allocation10 + $0x28] sm:$0xff] }
 0x124   :  { %2111 = vmatpush.bf16.msra.mxu0 %v3383_v48  ;;  %v1537_v52 = vadd.f32 %v1536_v8, %v1524_v46  ;;  %v3403_v55 = vor.u32 %v3738_v11, %v3400_v12  ;;  %v3750_v3 = vld [vmem:[#allocation10 + $0x30] sm:$0xff]  ;;  %v3744_v12 = vld [vmem:[#allocation10] sm:$0xff] }
 0x127   :  { %v1512_v29 = vpop.f32.mrf.mxu3  ;;  %2151 = vmatpush.bf16.msrb.mxu2 %v3315_v19 }
 0x128   :  { %2112 = vmatpush.bf16.msra.mxu0 %v3375_v53 }
 0x12a   :  { %v1538_v28 = vpop.f32.mrf.mxu2  ;;  %v1575_v34 = vpop.f32.mrf.mxu0 }
 0x12b   :  { %2152 = vmatpush.bf16.msrb.mxu2 %v3307_v45  ;;  %v3371_v28 = vor.u32 %v3730_v25, %v3368_v26 }
 0x12c   :  { %2113 = vmatpush.bf16.msra.mxu0 %v3367_v60 }
 0x12f   :  { %2153 = vmatpush.bf16.msrb.mxu2 %v3299_v38 }
 0x130   :  { %2114 = vmatpush.bf16.msra.mxu0 %v3359_v1 }
 0x132   :  { %v1577_v43 = vpop.f32.mrf.mxu0 }
 0x134   :  { %2159 = vmatpush.bf16.msrb.mxu0 %v3419_v39  ;;  %v3748_v39 = vld [vmem:[#allocation10 + $0x20] sm:$0xff] }
 0x137   :  { %v1549_v47 = vpop.f32.mrf.mxu1 }
 0x138   :  { %v1550_v27 = vadd.f32 %v1549_v47, %v1537_v52  ;;  %2160 = vmatpush.bf16.msrb.mxu0 %v3411_v9  ;;  %v3746_v9 = vld [vmem:[#allocation10 + $0x10] sm:$0xff] }
 0x13c   :  { %2161 = vmatpush.bf16.msrb.mxu0 %v3403_v55  ;;  %v3756_v55 = vld [vmem:[#allocation10 + $0x60] sm:$0xff] }
 0x13e   :  { %v1601_v62 = vpop.f32.mrf.mxu0 }
 0x13f   :  { %v1562_v54 = vpop.f32.mrf.mxu3  ;;  %v1551_v59 = vpop.f32.mrf.mxu1 }
 0x140   :  { %v1563_v58 = vadd.f32 %v1562_v54, %v1550_v27  ;;  %2162 = vmatpush.bf16.msrb.mxu0 %v3395_v16  ;;  %v1742_v27 = vld [vmem:[%s4077_s4] sm:$0x3]  ;;  %v3754_v16 = vld [vmem:[#allocation10 + $0x50] sm:$0xff] }
 0x141   :  { %v1744_v54 = vperm.slane %v1742_v27, 0 }
 0x142   :  { %v1588_v61 = vpop.f32.mrf.mxu2  ;;  %v1576_v0 = vadd.f32 %v1575_v34, %v1563_v58  ;;  %v3728_v34 = vld [vmem:[#allocation8 + $0x184] sm:$0xf] }
 0x143   :  { %v1589_v45 = vadd.f32 %v1588_v61, %v317_v23  ;;  %v3363_v40 = vor.u32 %v3728_v34, %v3360_v36  ;;  %v1745_v61 = vperm.slane %v1742_v27, 1  ;;  %v3772_v34 = vld [vmem:[%s4079_s6] ss:$0 sm:$0xff]  ;;  %s3940_s6 = smov [#allocation11]  }
 0x144   :  { %v1672_v2 = vmax.f32 %v1576_v0, 0.0  ;;  %2163 = vmatpush.bf16.msrb.mxu0 %v3387_v20  ;;  %s2362_s30 = sshll.u32 %s3940_s6, 4  ;;  %s2363_s30 = int_to_ptr.vmem [resolvable:$true] %s2362_s30 }
 0x145   :  { %v1602_v38 = vadd.f32 %v1601_v62, %v1589_v45 }
 0x146   :  { %v1676_v6 = vpack.c.bf16 %v1672_v2, %v1672_v2  ;;  %v1603_v37 = vpop.f32.mrf.mxu0  ;;  %v3751_v2 = vld [vmem:[#allocation10 + $0x38] sm:$0xff] }
 0x147   :  { %v1564_v8 = vpop.f32.mrf.mxu3  ;;  %2308 = vmatpush.bf16.msra.mxu3 %v3751_v2  ;;  %v3757_v37 = vld [vmem:[#allocation10 + $0x68] sm:$0xff] }
 0x148   :  { %2102 = vmatmul.bf16.vlgmr.msra.gmra.mxu2 %v1676_v6  ;;  %2164 = vmatpush.bf16.msrb.mxu0 %v3379_v24 }
 0x14a   :  { %v1590_v10 = vpop.f32.mrf.mxu2 }
 0x14b   :  { %2309 = vmatpush.bf16.msra.mxu3 %v3750_v3  ;;  %v3745_v10 = vld [vmem:[#allocation10 + $0x8] sm:$0xff] }
 0x14c   :  { %2165 = vmatpush.bf16.msrb.mxu0 %v3371_v28 }
 0x14f   :  { %2310 = vmatpush.bf16.msra.mxu3 %v3749_v5 }
 0x150   :  { %2166 = vmatpush.bf16.msrb.mxu0 %v3363_v40 }
 0x153   :  { %2311 = vmatpush.bf16.msra.mxu3 %v3748_v39 }
 0x157   :  { %v1614_v19 = vpop.f32.mrf.mxu1  ;;  %2312 = vmatpush.bf16.msra.mxu3 %v3747_v35 }
 0x158   :  { %2154 = vmatmul.bf16.vlgmr.msrb.gmra.mxu2 %v1676_v6  ;;  %v1615_v14 = vadd.f32 %v1614_v19, %v1602_v38  ;;  %v3759_v6 = vld [vmem:[#allocation10 + $0x78] sm:$0xff]  ;;  %v3752_v19 = vld [vmem:[#allocation10 + $0x40] sm:$0xff] }
 0x159   :  { %2321 = vmatpush.bf16.msra.mxu1 %v3759_v6 }
 0x15b   :  { %2313 = vmatpush.bf16.msra.mxu3 %v3746_v9 }
 0x15d   :  { %2322 = vmatpush.bf16.msra.mxu1 %v3758_v7 }
 0x15e   :  { %v1653_v33 = vpop.f32.mrf.mxu0 }
 0x15f   :  { %v1627_v29 = vpop.f32.mrf.mxu3  ;;  %v1616_v31 = vpop.f32.mrf.mxu1  ;;  %2314 = vmatpush.bf16.msra.mxu3 %v3745_v10 }
 0x160   :  { %v1628_v42 = vadd.f32 %v1627_v29, %v1615_v14 }
 0x161   :  { %2323 = vmatpush.bf16.msra.mxu1 %v3757_v37 }
 0x162   :  { %v1640_v32 = vpop.f32.mrf.mxu2 }
 0x163   :  { %v1641_v44 = vadd.f32 %v1640_v32, %v1628_v42  ;;  %2315 = vmatpush.bf16.msra.mxu3 %v3744_v12 }
 0x165   :  { %v1654_v51 = vadd.f32 %v1653_v33, %v1641_v44  ;;  %2324 = vmatpush.bf16.msra.mxu1 %v3756_v55 }
 0x166   :  { %v1655_v43 = vpop.f32.mrf.mxu0 }
 0x167   :  { %v1629_v41 = vpop.f32.mrf.mxu3 }
 0x169   :  { %2325 = vmatpush.bf16.msra.mxu1 %v3755_v13 }
 0x16a   :  { %v1642_v49 = vpop.f32.mrf.mxu2 }
 0x16d   :  { %2326 = vmatpush.bf16.msra.mxu1 %v3754_v16 }
 0x171   :  { %2327 = vmatpush.bf16.msra.mxu1 %v3753_v17 }
 0x172   :  { %v1666_v46 = vpop.f32.mrf.mxu2 }
 0x173   :  { %v1667_v47 = vadd.f32 %v1666_v46, %v1654_v51 }
 0x175   :  { %v1673_v48 = vmax.f32 %v1667_v47, 0.0  ;;  %2328 = vmatpush.bf16.msra.mxu1 %v3752_v19 }
 0x177   :  { %v1677_v57 = vpack.c.bf16 %v1673_v48, %v1673_v48 }
 0x179   :  { %2115 = vmatmul.bf16.vlgmr.msra.gmra.mxu0 %v1677_v57 }
 0x17a   :  { %v1668_v50 = vpop.f32.mrf.mxu2 }
 0x17f   :  { %v2077_v52 = vpop.f32.mrf.mxu3 }
 0x180   :  { %v2078_v56 = vadd.f32 %v2077_v52, %v1744_v54 }
 0x187   :  { %v2079_v53 = vpop.f32.mrf.mxu3 }
 0x189   :  { %2167 = vmatmul.bf16.vlgmr.msrb.gmra.mxu0 %v1677_v57 }
 0x18a   :  { %v2090_v30 = vpop.f32.mrf.mxu1 }
 0x18b   :  { %v2091_v58 = vadd.f32 %v2090_v30, %v2078_v56 }
 0x192   :  { %v2092_v60 = vpop.f32.mrf.mxu1 }
 0x19a   :  { %v2142_v63 = vpop.f32.mrf.mxu1 }
 0x19f   :  { %v2129_v59 = vpop.f32.mrf.mxu3 }
 0x1a0   :  { %v2130_v4 = vadd.f32 %v2129_v59, %v1745_v61 }
 0x1a2   :  { %v2143_v0 = vadd.f32 %v2142_v63, %v2130_v4  ;;  %v2144_v1 = vpop.f32.mrf.mxu1 }
 0x1a7   :  { %v2131_v62 = vpop.f32.mrf.mxu3 }
 0x1cb   :  { %v2103_v8 = vpop.f32.mrf.mxu2 }
 0x1cc   :  { %v2104_v20 = vadd.f32 %v2103_v8, %v2091_v58 }
 0x1d3   :  { %v2105_v11 = vpop.f32.mrf.mxu2 }
 0x1db   :  { %v2155_v15 = vpop.f32.mrf.mxu2 }
 0x1dc   :  { %v2156_v26 = vadd.f32 %v2155_v15, %v2143_v0 }
 0x1e3   :  { %v2157_v18 = vpop.f32.mrf.mxu2 }
 0x1f6   :  { %v2116_v21 = vpop.f32.mrf.mxu0 }
 0x1f7   :  { %v2117_v22 = vadd.f32 %v2116_v21, %v2104_v20 }
 0x1f9   :  { %v2172_v23 = vmax.f32 %v2117_v22, 0.0 }
 0x1fb   :  { %v2174_v24 = vpack.c.bf16 %v2172_v23, %v2172_v23 }
 0x1fd   :  { %2316 = vmatmul.bf16.vlgmr.msra.gmra.mxu3 %v2174_v24 }
 0x1fe   :  { %v2118_v25 = vpop.f32.mrf.mxu0 }
 0x206   :  { %v2168_v28 = vpop.f32.mrf.mxu0 }
 0x207   :  { %v2169_v29 = vadd.f32 %v2168_v28, %v2156_v26 }
 0x209   :  { %v2173_v45 = vmax.f32 %v2169_v29, 0.0 }
 0x20b   :  { %v2175_v31 = vpack.c.bf16 %v2173_v45, %v2173_v45 }
 0x20d   :  { %2329 = vmatmul.bf16.vlgmr.msra.gmra.mxu1 %v2175_v31 }
 0x20e   :  { %v2170_v32 = vpop.f32.mrf.mxu0 }
 0x280   :  { %v2317_v33 = vpop.f32.mrf.mxu3 }
 0x281   :  { %v2318_v38 = vadd.f32 %v3772_v34, %v2317_v33 }
 0x288   :  { %v2319_v36 = vpop.f32.mrf.mxu3 }
 0x28a   :  { %v2330_v40 = vpop.f32.mrf.mxu1 }
 0x28b   :  { %v2331_v14 = vadd.f32 %v2330_v40, %v2318_v38 }
 0x28d   :  { %2334 = vmax.xlane.f32.xlu0 %v2331_v14 }
 0x292   :  { %v2332_v41 = vpop.f32.mrf.mxu1 }
 0x300   :  { %v2335_v42 = vpop.xlane.xlu0 %2334 }
 0x301   :  { %v2336_v49 = vsub.f32 %v2331_v14, %v2335_v42 }
 0x303   :  { %v2337_v43 = vmul.f32 1.442695, %v2336_v49 }
 0x305   :  { %3773 = vpow2.f32 %v2337_v43 }
 0x30b   :  { %v3774_v44 = vpop.eup %3773 }
 0x30c   :  { %2339 = vadd.xlane.f32.xlu0 %v3774_v44 }
 0x37f   :  { %v2340_v51 = vpop.xlane.xlu0 %2339 }
 0x380   :  { %3775 = vrcp.f32 %v2340_v51  ;;  %v2352_v57 = vand.u32 2147483648, %v2340_v51  ;;  %v2350_v52 = vand.u32 2147483647, %v2340_v51  ;;  %vm2346_vm2 = vweird.f32 %v2340_v51 }
 0x382   :  { %v2353_v27 = vor.u32 1.1754944e-38, %v2352_v57  ;;  %vm2351_vm4 = vcmp.eq.f32.partialorder %v2350_v52, 8.507059e+37 }
 0x386   :  { %v3776_v46 = vpop.eup %3775 }
 0x387   :  { %v2342_v47 = vmul.f32 %v3776_v46, %v2340_v51  ;;  %vm2347_vm1 = vweird.f32 %v3776_v46 }
 0x388   :  { %vm2348_vm3 = vmor %vm2346_vm2, %vm2347_vm1 }
 0x389   :  { %v2343_v48 = vsub.f32 1.0, %v2342_v47 }
 0x38b   :  { %v2344_v50 = vmul.f32 %v3776_v46, %v2343_v48 }
 0x38d   :  { %v2345_v53 = vadd.f32 %v3776_v46, %v2344_v50 }
 0x38f   :  { %v2349_v54 = vsel %vm2348_vm3, %v3776_v46, %v2345_v53 }
 0x390   :  { %v2354_v56 = vsel %vm2351_vm4, %v2353_v27, %v2349_v54 }
 0x391   :  { %v2355_v30 = vmul.f32 %v3774_v44, %v2354_v56 }
 0x393   :  { %2356 = vst [vmem:[#allocation11] sm:$0xff] %v2355_v30 }
 0x394   :  { %2367 = dma.vmem_to_hbm [thread:$0]  %s2363_s30, 128, %s2365_s10, [#allocation4]  }
 0x395   :  { %3927 = dma.done.wait [#allocation4], 128  }
 0x396   :  { %3928 = vsyncadd [#allocation4], 4294967168 }
 0x397   :  { %2372 = vsyncpa [#allocation3], 1 }
 0x398   :  { %2373 = vsyncpa [#allocation6], 1 }
 0x399   :  { %2374 = vsyncpa [#allocation9], 1 }
 0x39a   :  { %2375 = vsyncpa [#allocation4], 1 }

</bundles_post_ra>
